<compile_context>
chip_gen: v6e
topology: v6e:2x2x1
jax: 0.10.0
libtpu: 0.0.40
codegen_flags: <defaults>
</compile_context>

<pallas_src>
import functools
import numpy as np
import jax
import jax.numpy as jnp
from jax import lax
from jax.experimental import pallas as pl
from jax.experimental.pallas import tpu as pltpu

EPS = 1e-8          # matches torch.nn.LayerNorm(hidden, eps=1e-08)
NEG_INF = -1e30


def _layernorm(x, g, b):
    mu = jnp.mean(x, axis=-1, keepdims=True)
    var = jnp.mean((x - mu) ** 2, axis=-1, keepdims=True)
    return (x - mu) * lax.rsqrt(var + EPS) * g + b


# bf16 MXU operands, f32 accumulation.  These helpers are shared by the Pallas
# kernel and the pure-JAX reference so both apply the identical dtype policy.
def _mxu(a, w):
    return jnp.dot(a.astype(jnp.bfloat16), w.astype(jnp.bfloat16),
                   preferred_element_type=jnp.float32)


def _mxu_bqk(q, k):                      # scores:  (B,L,hd) x (B,L,hd) -> (B,L,L)
    return jnp.einsum("bqd,bkd->bqk", q.astype(jnp.bfloat16),
                      k.astype(jnp.bfloat16),
                      preferred_element_type=jnp.float32)


def _mxu_bqd(p, v):                      # context: (B,L,L) x (B,L,hd) -> (B,L,hd)
    return jnp.einsum("bqk,bkd->bqd", p.astype(jnp.bfloat16),
                      v.astype(jnp.bfloat16),
                      preferred_element_type=jnp.float32)


# ----------------------------------------------------------------------------
# Fused kernel: grid = (num_blocks,).  Activation lives in VMEM scratch.
# ----------------------------------------------------------------------------
def _sasrec_fused_kernel(num_heads, B, L,
                         x_ref, m_ref, pos_ref, neg_ref,
                         ln1g_ref, ln1b_ref, wq_ref, bq_ref, wkv_ref, bkv_ref,
                         wo_ref, bo_ref, ln2g_ref, ln2b_ref,
                         w1_ref, b1_ref, w2_ref, b2_ref,
                         lastg_ref, lastb_ref,
                         out_ref,
                         act_ref, attn_ref):
    blk = pl.program_id(0)
    D = x_ref.shape[-1]
    M = B * L
    H = num_heads
    hd = D // H
    scale = 1.0 / float(np.sqrt(hd))

    # block 0: load the (already masked) embedded sequence into the resident
    # activation scratch.
    @pl.when(blk == 0)
    def _init():
        act_ref[...] = x_ref[...]

    x2 = act_ref[...]                                           # (M, D) f32

    # ---- multi-head self-attention --------------------------------------
    # Q from the LayerNormed sequence, K/V from the raw sequence (PyTorch:
    # MHA(query=LN(x), key=x, value=x)), so only K|V share one fused matmul.
    q_ln = _layernorm(x2, ln1g_ref[...], ln1b_ref[...])         # (M, D)
    q = _mxu(q_ln, wq_ref[...]) + bq_ref[...]                   # (M, D)
    kv = _mxu(x2, wkv_ref[...]) + bkv_ref[...]                  # (M, 2D)

    q3 = q.reshape(B, L, D)
    k3 = kv[:, :D].reshape(B, L, D)
    v3 = kv[:, D:].reshape(B, L, D)

    rows = lax.broadcasted_iota(jnp.int32, (B, L, L), 1)
    cols = lax.broadcasted_iota(jnp.int32, (B, L, L), 2)
    causal = rows >= cols                                       # lower-tri allowed

    for h in range(H):
        sl = slice(h * hd, (h + 1) * hd)
        s = _mxu_bqk(q3[:, :, sl] * scale, k3[:, :, sl])        # (B, L, L)
        s = jnp.where(causal, s, NEG_INF)
        s = s - jnp.max(s, axis=-1, keepdims=True)
        p = jnp.exp(s)
        p = p * pl.reciprocal(jnp.sum(p, axis=-1, keepdims=True), approx=True)
        attn_ref[:, :, sl] = _mxu_bqd(p, v3[:, :, sl])          # (B, L, hd)

    attn = attn_ref[...].reshape(M, D)
    attn = _mxu(attn, wo_ref[...]) + bo_ref[...]
    seqs = q_ln + attn                                          # residual on LN'd query

    # ---- point-wise feed-forward (Conv1d k=1 == dense) -------------------
    y = _layernorm(seqs, ln2g_ref[...], ln2b_ref[...])
    h1 = jnp.maximum(_mxu(y, w1_ref[...]) + b1_ref[...], 0.0)
    ff = _mxu(h1, w2_ref[...]) + b2_ref[...]
    act_ref[...] = (y + ff) * m_ref[...]                        # padding mask

    # ---- last block: final LayerNorm + pos/neg logits --------------------
    @pl.when(blk == pl.num_programs(0) - 1)
    def _final():
        feats = _layernorm(act_ref[...], lastg_ref[...], lastb_ref[...])
        plog = jnp.sum(feats * pos_ref[...], axis=-1, keepdims=True)  # (M, 1)
        nlog = jnp.sum(feats * neg_ref[...], axis=-1, keepdims=True)  # (M, 1)
        out_ref[...] = jnp.concatenate([plog, nlog], axis=-1)         # (M, 2)


def forward(params, log_seqs, pos_seqs, neg_seqs, num_heads):
    item, pos_t = params["item"], params["pos"]
    bp = params["blocks"]
    B, L = log_seqs.shape
    D = item.shape[1]
    NB = bp["wq"].shape[0]
    M = B * L

    # glue: embedding gathers, scaling, positions, padding mask (plain XLA)
    x = item[log_seqs] * np.sqrt(D) + pos_t[jnp.arange(L)][None, :, :]
    mask = (log_seqs != 0).astype(jnp.float32).reshape(M, 1)
    x2 = x.reshape(M, D) * mask
    pos_e = item[pos_seqs].reshape(M, D)
    neg_e = item[neg_seqs].reshape(M, D)

    def full(shape):                      # whole array, constant block index
        return pl.BlockSpec(shape, lambda b, _n=len(shape): (0,) * _n)

    def blk3(a, c):                       # per-block slice, leading dim squeezed
        return pl.BlockSpec((None, a, c), lambda b: (b, 0, 0))

    in_specs = [
        full((M, D)), full((M, 1)), full((M, D)), full((M, D)),
        blk3(1, D), blk3(1, D),                 # ln1 gamma / beta
        blk3(D, D), blk3(1, D),                 # wq, bq
        blk3(D, 2 * D), blk3(1, 2 * D),         # fused wkv, bkv
        blk3(D, D), blk3(1, D),                 # wo, bo
        blk3(1, D), blk3(1, D),                 # ln2 gamma / beta
        blk3(D, D), blk3(1, D),                 # w1 (conv1), b1
        blk3(D, D), blk3(1, D),                 # w2 (conv2), b2
        full((1, D)), full((1, D)),             # last LayerNorm gamma / beta
    ]

    out = pl.pallas_call(
        functools.partial(_sasrec_fused_kernel, num_heads, B, L),
        out_shape=jax.ShapeDtypeStruct((M, 2), jnp.float32),
        grid=(NB,),
        in_specs=in_specs,
        out_specs=pl.BlockSpec((M, 2), lambda b: (0, 0)),
        scratch_shapes=[pltpu.VMEM((M, D), jnp.float32),     # resident activation
                        pltpu.VMEM((B, L, D), jnp.float32)],  # per-head accumulator
        compiler_params=pltpu.CompilerParams(
            dimension_semantics=("arbitrary",)),
    )(x2, mask, pos_e, neg_e,
      bp["ln1_g"], bp["ln1_b"], bp["wq"], bp["bq"], bp["wkv"], bp["bkv"],
      bp["wo"], bp["bo"], bp["ln2_g"], bp["ln2_b"],
      bp["w1"], bp["b1"], bp["w2"], bp["b2"],
      params["last_g"], params["last_b"])

    pos_logits = out[:, 0].reshape(B, L)
    neg_logits = out[:, 1].reshape(B, L)
    return pos_logits, neg_logits


# ----------------------------------------------------------------------------
# Parameter init (deterministic, synthetic).  Weight matrices stored bf16
# (MXU operands), biases / LN params f32.
# ----------------------------------------------------------------------------
def init_params(key, item_num, maxlen, D, num_blocks):
    ks = jax.random.split(key, 12)
    item = jax.random.normal(ks[0], (item_num + 1, D), jnp.float32) * 0.02
    item = item.at[0].set(0.0)                          # padding_idx=0
    pos = jax.random.normal(ks[1], (maxlen, D), jnp.float32) * 0.02
    NB = num_blocks

    def w(k, shape, s=0.05):
        return (jax.random.normal(k, shape, jnp.float32) * s).astype(jnp.bfloat16)

    def b(k, shape, s=0.01):
        return jax.random.normal(k, shape, jnp.float32) * s

    blocks = dict(
        ln1_g=jnp.ones((NB, 1, D), jnp.float32), ln1_b=jnp.zeros((NB, 1, D), jnp.float32),
        wq=w(ks[2], (NB, D, D)),       bq=b(ks[3], (NB, 1, D)),
        wkv=w(ks[4], (NB, D, 2 * D)),  bkv=b(ks[5], (NB, 1, 2 * D)),
        wo=w(ks[6], (NB, D, D)),       bo=b(ks[7], (NB, 1, D)),
        ln2_g=jnp.ones((NB, 1, D), jnp.float32), ln2_b=jnp.zeros((NB, 1, D), jnp.float32),
        w1=w(ks[8], (NB, D, D)),       b1=b(ks[9], (NB, 1, D)),
        w2=w(ks[10], (NB, D, D)),      b2=b(ks[11], (NB, 1, D)),
    )
    return dict(item=item, pos=pos, blocks=blocks,
                last_g=jnp.ones((1, D), jnp.float32),
                last_b=jnp.zeros((1, D), jnp.float32))


# ----------------------------------------------------------------------------
# Pure-JAX reference (same math and same bf16-operand / f32-accumulate dtype
# policy, no Pallas) for the correctness check.
# ----------------------------------------------------------------------------
def reference_forward(params, log_seqs, pos_seqs, neg_seqs, num_heads):
    item, pos_t = params["item"], params["pos"]
    bp = params["blocks"]
    B, L = log_seqs.shape
    D = item.shape[1]
    NB = bp["wq"].shape[0]
    M = B * L
    H = num_heads
    hd = D // H
    scale = 1.0 / float(np.sqrt(hd))

    x = item[log_seqs] * np.sqrt(D) + pos_t[jnp.arange(L)][None, :, :]
    m2 = (log_seqs != 0).astype(jnp.float32).reshape(M, 1)
    x2 = x.reshape(M, D) * m2

    causal = jnp.tril(jnp.ones((L, L), bool))[None]      # (1, L, L)
    for i in range(NB):
        q_ln = _layernorm(x2, bp["ln1_g"][i], bp["ln1_b"][i])
        q = _mxu(q_ln, bp["wq"][i]) + bp["bq"][i]
        kv = _mxu(x2, bp["wkv"][i]) + bp["bkv"][i]
        q3 = q.reshape(B, L, D)
        k3 = kv[:, :D].reshape(B, L, D)
        v3 = kv[:, D:].reshape(B, L, D)
        heads = []
        for h in range(H):
            sl = slice(h * hd, (h + 1) * hd)
            s = _mxu_bqk(q3[:, :, sl] * scale, k3[:, :, sl])
            s = jnp.where(causal, s, NEG_INF)
            p = jax.nn.softmax(s, axis=-1)
            heads.append(_mxu_bqd(p, v3[:, :, sl]))
        attn = jnp.concatenate(heads, axis=-1).reshape(M, D)
        attn = _mxu(attn, bp["wo"][i]) + bp["bo"][i]
        seqs = q_ln + attn
        y = _layernorm(seqs, bp["ln2_g"][i], bp["ln2_b"][i])
        h1 = jnp.maximum(_mxu(y, bp["w1"][i]) + bp["b1"][i], 0.0)
        ff = _mxu(h1, bp["w2"][i]) + bp["b2"][i]
        x2 = (y + ff) * m2

    feats = _layernorm(x2, params["last_g"], params["last_b"])
    pos_logits = jnp.sum(feats * item[pos_seqs].reshape(M, D), axis=-1).reshape(B, L)
    neg_logits = jnp.sum(feats * item[neg_seqs].reshape(M, D), axis=-1).reshape(B, L)
    return pos_logits, neg_logits


if __name__ == "__main__":
    item_num, hidden, num_heads, num_blocks, maxlen = 50, 32, 2, 2, 8
    B, L = 2, maxlen

    key = jax.random.PRNGKey(0)
    k_param, k_seq, k_pos, k_neg = jax.random.split(key, 4)
    params = init_params(k_param, item_num, maxlen, hidden, num_blocks)

    log_seqs = jax.random.randint(k_seq, (B, L), 0, item_num + 1, dtype=jnp.int32)
    log_seqs = log_seqs.at[0, :2].set(0)            # some padding (id 0)
    pos_seqs = jax.random.randint(k_pos, (B, L), 1, item_num + 1, dtype=jnp.int32)
    neg_seqs = jax.random.randint(k_neg, (B, L), 1, item_num + 1, dtype=jnp.int32)

    pos_logits, neg_logits = forward(params, log_seqs, pos_seqs, neg_seqs, num_heads)
    jax.block_until_ready((pos_logits, neg_logits))

    rpos, rneg = reference_forward(params, log_seqs, pos_seqs, neg_seqs, num_heads)
    # Kernel and reference share the bf16-operand / f32-accumulation policy;
    # residual mismatch is MXU accumulation order + the approximate EUP
    # reciprocal used in the kernel's softmax normalization.
    np.testing.assert_allclose(np.asarray(pos_logits), np.asarray(rpos), rtol=2e-3, atol=2e-3)
    np.testing.assert_allclose(np.asarray(neg_logits), np.asarray(rneg), rtol=2e-3, atol=2e-3)

    print("KERNEL_OK")
</pallas_src>

<mosaic_0001>
module attributes {stable_mosaic.version = 11 : i64} {
  func.func @_sasrec_fused_kernel(%arg0: i32, %arg1: memref<16x32xf32, #tpu.memory_space<vmem>>, %arg2: memref<16x1xf32, #tpu.memory_space<vmem>>, %arg3: memref<16x32xf32, #tpu.memory_space<vmem>>, %arg4: memref<16x32xf32, #tpu.memory_space<vmem>>, %arg5: memref<1x1x32xf32, #tpu.memory_space<vmem>>, %arg6: memref<1x1x32xf32, #tpu.memory_space<vmem>>, %arg7: memref<1x32x32xbf16, #tpu.memory_space<vmem>>, %arg8: memref<1x1x32xf32, #tpu.memory_space<vmem>>, %arg9: memref<1x32x64xbf16, #tpu.memory_space<vmem>>, %arg10: memref<1x1x64xf32, #tpu.memory_space<vmem>>, %arg11: memref<1x32x32xbf16, #tpu.memory_space<vmem>>, %arg12: memref<1x1x32xf32, #tpu.memory_space<vmem>>, %arg13: memref<1x1x32xf32, #tpu.memory_space<vmem>>, %arg14: memref<1x1x32xf32, #tpu.memory_space<vmem>>, %arg15: memref<1x32x32xbf16, #tpu.memory_space<vmem>>, %arg16: memref<1x1x32xf32, #tpu.memory_space<vmem>>, %arg17: memref<1x32x32xbf16, #tpu.memory_space<vmem>>, %arg18: memref<1x1x32xf32, #tpu.memory_space<vmem>>, %arg19: memref<1x32xf32, #tpu.memory_space<vmem>>, %arg20: memref<1x32xf32, #tpu.memory_space<vmem>>, %arg21: memref<16x2xf32, #tpu.memory_space<vmem>>, %arg22: memref<16x32xf32, #tpu.memory_space<vmem>>, %arg23: memref<2x8x32xf32, #tpu.memory_space<vmem>>) attributes {dimension_semantics = [#tpu.dimension_semantics<arbitrary>], iteration_bounds = array<i64: 2>, scalar_prefetch = 0 : i64, scratch_operands = 2 : i64, tpu.core_type = #tpu.core_type<tc>, window_params = [{pipeline_mode = #tpu.pipeline_mode<synchronous>, transform_indices = @transform_0, window_bounds = array<i64: 16, 32>}, {pipeline_mode = #tpu.pipeline_mode<synchronous>, transform_indices = @transform_1, window_bounds = array<i64: 16, 1>}, {pipeline_mode = #tpu.pipeline_mode<synchronous>, transform_indices = @transform_2, window_bounds = array<i64: 16, 32>}, {pipeline_mode = #tpu.pipeline_mode<synchronous>, transform_indices = @transform_3, window_bounds = array<i64: 16, 32>}, {transform_indices = @transform_4, window_bounds = array<i64: 1, 1, 32>}, {transform_indices = @transform_5, window_bounds = array<i64: 1, 1, 32>}, {transform_indices = @transform_6, window_bounds = array<i64: 1, 32, 32>}, {transform_indices = @transform_7, window_bounds = array<i64: 1, 1, 32>}, {transform_indices = @transform_8, window_bounds = array<i64: 1, 32, 64>}, {transform_indices = @transform_9, window_bounds = array<i64: 1, 1, 64>}, {transform_indices = @transform_10, window_bounds = array<i64: 1, 32, 32>}, {transform_indices = @transform_11, window_bounds = array<i64: 1, 1, 32>}, {transform_indices = @transform_12, window_bounds = array<i64: 1, 1, 32>}, {transform_indices = @transform_13, window_bounds = array<i64: 1, 1, 32>}, {transform_indices = @transform_14, window_bounds = array<i64: 1, 32, 32>}, {transform_indices = @transform_15, window_bounds = array<i64: 1, 1, 32>}, {transform_indices = @transform_16, window_bounds = array<i64: 1, 32, 32>}, {transform_indices = @transform_17, window_bounds = array<i64: 1, 1, 32>}, {pipeline_mode = #tpu.pipeline_mode<synchronous>, transform_indices = @transform_18, window_bounds = array<i64: 1, 32>}, {pipeline_mode = #tpu.pipeline_mode<synchronous>, transform_indices = @transform_19, window_bounds = array<i64: 1, 32>}, {pipeline_mode = #tpu.pipeline_mode<synchronous>, transform_indices = @transform_20, window_bounds = array<i64: 16, 2>}]} {
    %c0_i32 = arith.constant 0 : i32
    %0 = arith.cmpi eq, %arg0, %c0_i32 : i32
    %1 = arith.extui %0 : i1 to i32
    %c0_i32_0 = arith.constant 0 : i32
    %2 = arith.cmpi ne, %1, %c0_i32_0 : i32
    scf.if %2 {
      %c0_84 = arith.constant 0 : index
      %c0_85 = arith.constant 0 : index
      %165 = vector.load %arg1[%c0_84, %c0_85] : memref<16x32xf32, #tpu.memory_space<vmem>>, vector<16x32xf32>
      %c0_86 = arith.constant 0 : index
      %c0_87 = arith.constant 0 : index
      %166 = vector.load %arg22[%c0_86, %c0_87] : memref<16x32xf32, #tpu.memory_space<vmem>>, vector<16x32xf32>
      tpu.vector_store %arg22[%c0_86, %c0_87], %165 {strides = array<i32>} : memref<16x32xf32, #tpu.memory_space<vmem>>, vector<16x32xf32>,
    } else {
    }
    %c0 = arith.constant 0 : index
    %c0_1 = arith.constant 0 : index
    %3 = vector.load %arg22[%c0, %c0_1] : memref<16x32xf32, #tpu.memory_space<vmem>>, vector<16x32xf32>
    %c0_2 = arith.constant 0 : index
    %c0_3 = arith.constant 0 : index
    %c0_4 = arith.constant 0 : index
    %4 = vector.load %arg5[%c0_2, %c0_3, %c0_4] : memref<1x1x32xf32, #tpu.memory_space<vmem>>, vector<1x1x32xf32>
    %5 = vector.shape_cast %4 : vector<1x1x32xf32> to vector<1x32xf32>
    %c0_5 = arith.constant 0 : index
    %c0_6 = arith.constant 0 : index
    %c0_7 = arith.constant 0 : index
    %6 = vector.load %arg6[%c0_5, %c0_6, %c0_7] : memref<1x1x32xf32, #tpu.memory_space<vmem>>, vector<1x1x32xf32>
    %7 = vector.shape_cast %6 : vector<1x1x32xf32> to vector<1x32xf32>
    %cst = arith.constant dense<0.000000e+00> : vector<16xf32>
    %8 = vector.multi_reduction <add>, %3, %cst [1] : vector<16x32xf32> to vector<16xf32>
    %9 = vector.shape_cast %8 : vector<16xf32> to vector<16x1xf32>
    %cst_8 = arith.constant 3.200000e+01 : f32
    %10 = vector.broadcast %cst_8 : f32 to vector<16x1xf32>
    %11 = arith.divf %9, %10 : vector<16x1xf32>
    %12 = vector.broadcast %11 : vector<16x1xf32> to vector<16x32xf32>
    %13 = arith.subf %3, %12 : vector<16x32xf32>
    %14 = arith.mulf %13, %13 : vector<16x32xf32>
    %cst_9 = arith.constant dense<0.000000e+00> : vector<16xf32>
    %15 = vector.multi_reduction <add>, %14, %cst_9 [1] : vector<16x32xf32> to vector<16xf32>
    %16 = vector.shape_cast %15 : vector<16xf32> to vector<16x1xf32>
    %cst_10 = arith.constant 3.200000e+01 : f32
    %17 = vector.broadcast %cst_10 : f32 to vector<16x1xf32>
    %18 = arith.divf %16, %17 : vector<16x1xf32>
    %19 = vector.broadcast %11 : vector<16x1xf32> to vector<16x32xf32>
    %20 = arith.subf %3, %19 : vector<16x32xf32>
    %cst_11 = arith.constant 9.99999993E-9 : f32
    %21 = vector.broadcast %cst_11 : f32 to vector<16x1xf32>
    %22 = arith.addf %18, %21 : vector<16x1xf32>
    %23 = math.rsqrt %22 : vector<16x1xf32>
    %24 = vector.broadcast %23 : vector<16x1xf32> to vector<16x32xf32>
    %25 = arith.mulf %20, %24 : vector<16x32xf32>
    %26 = vector.broadcast %5 : vector<1x32xf32> to vector<16x32xf32>
    %27 = arith.mulf %25, %26 : vector<16x32xf32>
    %28 = vector.broadcast %7 : vector<1x32xf32> to vector<16x32xf32>
    %29 = arith.addf %27, %28 : vector<16x32xf32>
    %c0_12 = arith.constant 0 : index
    %c0_13 = arith.constant 0 : index
    %c0_14 = arith.constant 0 : index
    %30 = vector.load %arg7[%c0_12, %c0_13, %c0_14] : memref<1x32x32xbf16, #tpu.memory_space<vmem>>, vector<1x32x32xbf16>
    %31 = vector.shape_cast %30 : vector<1x32x32xbf16> to vector<32x32xbf16>
    %32 = arith.truncf %29 : vector<16x32xf32> to vector<16x32xbf16>
    %cst_15 = arith.constant dense<0.000000e+00> : vector<16x32xf32>
    %33 = tpu.matmul %32, %31, %cst_15 {dimension_numbers = #tpu.dot_dimension_numbers<[1], [0], [0], [1], [0, 0, 1, 1], [], []>} : vector<16x32xbf16>, vector<32x32xbf16>, vector<16x32xf32> -> vector<16x32xf32>
    %c0_16 = arith.constant 0 : index
    %c0_17 = arith.constant 0 : index
    %c0_18 = arith.constant 0 : index
    %34 = vector.load %arg8[%c0_16, %c0_17, %c0_18] : memref<1x1x32xf32, #tpu.memory_space<vmem>>, vector<1x1x32xf32>
    %35 = vector.shape_cast %34 : vector<1x1x32xf32> to vector<1x32xf32>
    %36 = vector.broadcast %35 : vector<1x32xf32> to vector<16x32xf32>
    %37 = arith.addf %33, %36 : vector<16x32xf32>
    %c0_19 = arith.constant 0 : index
    %c0_20 = arith.constant 0 : index
    %c0_21 = arith.constant 0 : index
    %38 = vector.load %arg9[%c0_19, %c0_20, %c0_21] : memref<1x32x64xbf16, #tpu.memory_space<vmem>>, vector<1x32x64xbf16>
    %39 = vector.shape_cast %38 : vector<1x32x64xbf16> to vector<32x64xbf16>
    %40 = arith.truncf %3 : vector<16x32xf32> to vector<16x32xbf16>
    %cst_22 = arith.constant dense<0.000000e+00> : vector<16x64xf32>
    %41 = tpu.matmul %40, %39, %cst_22 {dimension_numbers = #tpu.dot_dimension_numbers<[1], [0], [0], [1], [0, 0, 1, 1], [], []>} : vector<16x32xbf16>, vector<32x64xbf16>, vector<16x64xf32> -> vector<16x64xf32>
    %c0_23 = arith.constant 0 : index
    %c0_24 = arith.constant 0 : index
    %c0_25 = arith.constant 0 : index
    %42 = vector.load %arg10[%c0_23, %c0_24, %c0_25] : memref<1x1x64xf32, #tpu.memory_space<vmem>>, vector<1x1x64xf32>
    %43 = vector.shape_cast %42 : vector<1x1x64xf32> to vector<1x64xf32>
    %44 = vector.broadcast %43 : vector<1x64xf32> to vector<16x64xf32>
    %45 = arith.addf %41, %44 : vector<16x64xf32>
    %46 = vector.shape_cast %37 : vector<16x32xf32> to vector<2x8x32xf32>
    %47 = vector.extract_strided_slice %45 {offsets = [0, 0], sizes = [16, 32], strides = [1, 1]} : vector<16x64xf32> to vector<16x32xf32>
    %48 = vector.shape_cast %47 : vector<16x32xf32> to vector<2x8x32xf32>
    %49 = vector.extract_strided_slice %45 {offsets = [0, 32], sizes = [16, 32], strides = [1, 1]} : vector<16x64xf32> to vector<16x32xf32>
    %50 = vector.shape_cast %49 : vector<16x32xf32> to vector<2x8x32xf32>
    %51 = tpu.iota {dimensions = array<i32: 1>} : vector<2x8x8xi32>
    %52 = tpu.iota {dimensions = array<i32: 2>} : vector<2x8x8xi32>
    %53 = arith.cmpi sge, %51, %52 : vector<2x8x8xi32>
    %54 = vector.extract_strided_slice %46 {offsets = [0, 0, 0], sizes = [2, 8, 16], strides = [1, 1, 1]} : vector<2x8x32xf32> to vector<2x8x16xf32>
    %cst_26 = arith.constant 2.500000e-01 : f32
    %55 = vector.broadcast %cst_26 : f32 to vector<2x8x16xf32>
    %56 = arith.mulf %54, %55 : vector<2x8x16xf32>
    %57 = vector.extract_strided_slice %48 {offsets = [0, 0, 0], sizes = [2, 8, 16], strides = [1, 1, 1]} : vector<2x8x32xf32> to vector<2x8x16xf32>
    %58 = arith.truncf %56 : vector<2x8x16xf32> to vector<2x8x16xbf16>
    %59 = arith.truncf %57 : vector<2x8x16xf32> to vector<2x8x16xbf16>
    "tpu.trace_start"() <{level = 10 : i32, message = "bqd,bkd->bqk"}> : () -> ()
    %cst_27 = arith.constant dense<0.000000e+00> : vector<2x8x8xf32>
    %60 = tpu.matmul %58, %59, %cst_27 {dimension_numbers = #tpu.dot_dimension_numbers<[2], [2], [1], [1], [0, 0, 0, 1, 1, 1], [0], [0]>} : vector<2x8x16xbf16>, vector<2x8x16xbf16>, vector<2x8x8xf32> -> vector<2x8x8xf32>
    %cst_28 = arith.constant -1.000000e+30 : f32
    "tpu.trace_stop"() : () -> ()
    %61 = vector.broadcast %cst_28 : f32 to vector<2x8x8xf32>
    %62 = arith.select %53, %60, %61 : vector<2x8x8xi1>, vector<2x8x8xf32>
    %cst_29 = arith.constant dense<0xFF800000> : vector<2x8xf32>
    %63 = vector.multi_reduction <maximumf>, %62, %cst_29 [2] : vector<2x8x8xf32> to vector<2x8xf32>
    %64 = vector.shape_cast %63 : vector<2x8xf32> to vector<2x8x1xf32>
    %65 = vector.broadcast %64 : vector<2x8x1xf32> to vector<2x8x8xf32>
    %66 = arith.subf %62, %65 : vector<2x8x8xf32>
    %67 = math.exp %66 : vector<2x8x8xf32>
    %cst_30 = arith.constant dense<0.000000e+00> : vector<2x8xf32>
    %68 = vector.multi_reduction <add>, %67, %cst_30 [2] : vector<2x8x8xf32> to vector<2x8xf32>
    %69 = vector.shape_cast %68 : vector<2x8xf32> to vector<2x8x1xf32>
    %70 = tpu.reciprocal %69 {approx = true} : vector<2x8x1xf32> -> vector<2x8x1xf32>
    %71 = vector.broadcast %70 : vector<2x8x1xf32> to vector<2x8x8xf32>
    %72 = arith.mulf %67, %71 : vector<2x8x8xf32>
    %73 = vector.extract_strided_slice %50 {offsets = [0, 0, 0], sizes = [2, 8, 16], strides = [1, 1, 1]} : vector<2x8x32xf32> to vector<2x8x16xf32>
    %74 = arith.truncf %72 : vector<2x8x8xf32> to vector<2x8x8xbf16>
    %75 = arith.truncf %73 : vector<2x8x16xf32> to vector<2x8x16xbf16>
    "tpu.trace_start"() <{level = 10 : i32, message = "bqk,bkd->bqd"}> : () -> ()
    %cst_31 = arith.constant dense<0.000000e+00> : vector<2x8x16xf32>
    %76 = tpu.matmul %74, %75, %cst_31 {dimension_numbers = #tpu.dot_dimension_numbers<[2], [1], [1], [2], [0, 0, 0, 1, 1, 2], [0], [0]>} : vector<2x8x8xbf16>, vector<2x8x16xbf16>, vector<2x8x16xf32> -> vector<2x8x16xf32>
    "tpu.trace_stop"() : () -> ()
    %c0_32 = arith.constant 0 : index
    %c0_33 = arith.constant 0 : index
    %c0_34 = arith.constant 0 : index
    %77 = vector.load %arg23[%c0_32, %c0_33, %c0_34] : memref<2x8x32xf32, #tpu.memory_space<vmem>>, vector<2x8x16xf32>
    tpu.vector_store %arg23[%c0_32, %c0_33, %c0_34], %76 {strides = array<i32>} : memref<2x8x32xf32, #tpu.memory_space<vmem>>, vector<2x8x16xf32>,
    %78 = vector.extract_strided_slice %46 {offsets = [0, 0, 16], sizes = [2, 8, 16], strides = [1, 1, 1]} : vector<2x8x32xf32> to vector<2x8x16xf32>
    %cst_35 = arith.constant 2.500000e-01 : f32
    %79 = vector.broadcast %cst_35 : f32 to vector<2x8x16xf32>
    %80 = arith.mulf %78, %79 : vector<2x8x16xf32>
    %81 = vector.extract_strided_slice %48 {offsets = [0, 0, 16], sizes = [2, 8, 16], strides = [1, 1, 1]} : vector<2x8x32xf32> to vector<2x8x16xf32>
    %82 = arith.truncf %80 : vector<2x8x16xf32> to vector<2x8x16xbf16>
    %83 = arith.truncf %81 : vector<2x8x16xf32> to vector<2x8x16xbf16>
    "tpu.trace_start"() <{level = 10 : i32, message = "bqd,bkd->bqk"}> : () -> ()
    %cst_36 = arith.constant dense<0.000000e+00> : vector<2x8x8xf32>
    %84 = tpu.matmul %82, %83, %cst_36 {dimension_numbers = #tpu.dot_dimension_numbers<[2], [2], [1], [1], [0, 0, 0, 1, 1, 1], [0], [0]>} : vector<2x8x16xbf16>, vector<2x8x16xbf16>, vector<2x8x8xf32> -> vector<2x8x8xf32>
    %cst_37 = arith.constant -1.000000e+30 : f32
    "tpu.trace_stop"() : () -> ()
    %85 = vector.broadcast %cst_37 : f32 to vector<2x8x8xf32>
    %86 = arith.select %53, %84, %85 : vector<2x8x8xi1>, vector<2x8x8xf32>
    %cst_38 = arith.constant dense<0xFF800000> : vector<2x8xf32>
    %87 = vector.multi_reduction <maximumf>, %86, %cst_38 [2] : vector<2x8x8xf32> to vector<2x8xf32>
    %88 = vector.shape_cast %87 : vector<2x8xf32> to vector<2x8x1xf32>
    %89 = vector.broadcast %88 : vector<2x8x1xf32> to vector<2x8x8xf32>
    %90 = arith.subf %86, %89 : vector<2x8x8xf32>
    %91 = math.exp %90 : vector<2x8x8xf32>
    %cst_39 = arith.constant dense<0.000000e+00> : vector<2x8xf32>
    %92 = vector.multi_reduction <add>, %91, %cst_39 [2] : vector<2x8x8xf32> to vector<2x8xf32>
    %93 = vector.shape_cast %92 : vector<2x8xf32> to vector<2x8x1xf32>
    %94 = tpu.reciprocal %93 {approx = true} : vector<2x8x1xf32> -> vector<2x8x1xf32>
    %95 = vector.broadcast %94 : vector<2x8x1xf32> to vector<2x8x8xf32>
    %96 = arith.mulf %91, %95 : vector<2x8x8xf32>
    %97 = vector.extract_strided_slice %50 {offsets = [0, 0, 16], sizes = [2, 8, 16], strides = [1, 1, 1]} : vector<2x8x32xf32> to vector<2x8x16xf32>
    %98 = arith.truncf %96 : vector<2x8x8xf32> to vector<2x8x8xbf16>
    %99 = arith.truncf %97 : vector<2x8x16xf32> to vector<2x8x16xbf16>
    "tpu.trace_start"() <{level = 10 : i32, message = "bqk,bkd->bqd"}> : () -> ()
    %cst_40 = arith.constant dense<0.000000e+00> : vector<2x8x16xf32>
    %100 = tpu.matmul %98, %99, %cst_40 {dimension_numbers = #tpu.dot_dimension_numbers<[2], [1], [1], [2], [0, 0, 0, 1, 1, 2], [0], [0]>} : vector<2x8x8xbf16>, vector<2x8x16xbf16>, vector<2x8x16xf32> -> vector<2x8x16xf32>
    "tpu.trace_stop"() : () -> ()
    %c0_41 = arith.constant 0 : index
    %c0_42 = arith.constant 0 : index
    %c16 = arith.constant 16 : index
    %101 = vector.load %arg23[%c0_41, %c0_42, %c16] : memref<2x8x32xf32, #tpu.memory_space<vmem>>, vector<2x8x16xf32>
    tpu.vector_store %arg23[%c0_41, %c0_42, %c16], %100 {strides = array<i32>} : memref<2x8x32xf32, #tpu.memory_space<vmem>>, vector<2x8x16xf32>,
    %c0_43 = arith.constant 0 : index
    %c0_44 = arith.constant 0 : index
    %c0_45 = arith.constant 0 : index
    %102 = vector.load %arg23[%c0_43, %c0_44, %c0_45] : memref<2x8x32xf32, #tpu.memory_space<vmem>>, vector<2x8x32xf32>
    %103 = vector.shape_cast %102 : vector<2x8x32xf32> to vector<16x32xf32>
    %c0_46 = arith.constant 0 : index
    %c0_47 = arith.constant 0 : index
    %c0_48 = arith.constant 0 : index
    %104 = vector.load %arg11[%c0_46, %c0_47, %c0_48] : memref<1x32x32xbf16, #tpu.memory_space<vmem>>, vector<1x32x32xbf16>
    %105 = vector.shape_cast %104 : vector<1x32x32xbf16> to vector<32x32xbf16>
    %106 = arith.truncf %103 : vector<16x32xf32> to vector<16x32xbf16>
    %cst_49 = arith.constant dense<0.000000e+00> : vector<16x32xf32>
    %107 = tpu.matmul %106, %105, %cst_49 {dimension_numbers = #tpu.dot_dimension_numbers<[1], [0], [0], [1], [0, 0, 1, 1], [], []>} : vector<16x32xbf16>, vector<32x32xbf16>, vector<16x32xf32> -> vector<16x32xf32>
    %c0_50 = arith.constant 0 : index
    %c0_51 = arith.constant 0 : index
    %c0_52 = arith.constant 0 : index
    %108 = vector.load %arg12[%c0_50, %c0_51, %c0_52] : memref<1x1x32xf32, #tpu.memory_space<vmem>>, vector<1x1x32xf32>
    %109 = vector.shape_cast %108 : vector<1x1x32xf32> to vector<1x32xf32>
    %110 = vector.broadcast %109 : vector<1x32xf32> to vector<16x32xf32>
    %111 = arith.addf %107, %110 : vector<16x32xf32>
    %112 = arith.addf %29, %111 : vector<16x32xf32>
    %c0_53 = arith.constant 0 : index
    %c0_54 = arith.constant 0 : index
    %c0_55 = arith.constant 0 : index
    %113 = vector.load %arg13[%c0_53, %c0_54, %c0_55] : memref<1x1x32xf32, #tpu.memory_space<vmem>>, vector<1x1x32xf32>
    %114 = vector.shape_cast %113 : vector<1x1x32xf32> to vector<1x32xf32>
    %c0_56 = arith.constant 0 : index
    %c0_57 = arith.constant 0 : index
    %c0_58 = arith.constant 0 : index
    %115 = vector.load %arg14[%c0_56, %c0_57, %c0_58] : memref<1x1x32xf32, #tpu.memory_space<vmem>>, vector<1x1x32xf32>
    %116 = vector.shape_cast %115 : vector<1x1x32xf32> to vector<1x32xf32>
    %cst_59 = arith.constant dense<0.000000e+00> : vector<16xf32>
    %117 = vector.multi_reduction <add>, %112, %cst_59 [1] : vector<16x32xf32> to vector<16xf32>
    %118 = vector.shape_cast %117 : vector<16xf32> to vector<16x1xf32>
    %cst_60 = arith.constant 3.200000e+01 : f32
    %119 = vector.broadcast %cst_60 : f32 to vector<16x1xf32>
    %120 = arith.divf %118, %119 : vector<16x1xf32>
    %121 = vector.broadcast %120 : vector<16x1xf32> to vector<16x32xf32>
    %122 = arith.subf %112, %121 : vector<16x32xf32>
    %123 = arith.mulf %122, %122 : vector<16x32xf32>
    %cst_61 = arith.constant dense<0.000000e+00> : vector<16xf32>
    %124 = vector.multi_reduction <add>, %123, %cst_61 [1] : vector<16x32xf32> to vector<16xf32>
    %125 = vector.shape_cast %124 : vector<16xf32> to vector<16x1xf32>
    %cst_62 = arith.constant 3.200000e+01 : f32
    %126 = vector.broadcast %cst_62 : f32 to vector<16x1xf32>
    %127 = arith.divf %125, %126 : vector<16x1xf32>
    %128 = vector.broadcast %120 : vector<16x1xf32> to vector<16x32xf32>
    %129 = arith.subf %112, %128 : vector<16x32xf32>
    %cst_63 = arith.constant 9.99999993E-9 : f32
    %130 = vector.broadcast %cst_63 : f32 to vector<16x1xf32>
    %131 = arith.addf %127, %130 : vector<16x1xf32>
    %132 = math.rsqrt %131 : vector<16x1xf32>
    %133 = vector.broadcast %132 : vector<16x1xf32> to vector<16x32xf32>
    %134 = arith.mulf %129, %133 : vector<16x32xf32>
    %135 = vector.broadcast %114 : vector<1x32xf32> to vector<16x32xf32>
    %136 = arith.mulf %134, %135 : vector<16x32xf32>
    %137 = vector.broadcast %116 : vector<1x32xf32> to vector<16x32xf32>
    %138 = arith.addf %136, %137 : vector<16x32xf32>
    %c0_64 = arith.constant 0 : index
    %c0_65 = arith.constant 0 : index
    %c0_66 = arith.constant 0 : index
    %139 = vector.load %arg15[%c0_64, %c0_65, %c0_66] : memref<1x32x32xbf16, #tpu.memory_space<vmem>>, vector<1x32x32xbf16>
    %140 = vector.shape_cast %139 : vector<1x32x32xbf16> to vector<32x32xbf16>
    %141 = arith.truncf %138 : vector<16x32xf32> to vector<16x32xbf16>
    %cst_67 = arith.constant dense<0.000000e+00> : vector<16x32xf32>
    %142 = tpu.matmul %141, %140, %cst_67 {dimension_numbers = #tpu.dot_dimension_numbers<[1], [0], [0], [1], [0, 0, 1, 1], [], []>} : vector<16x32xbf16>, vector<32x32xbf16>, vector<16x32xf32> -> vector<16x32xf32>
    %c0_68 = arith.constant 0 : index
    %c0_69 = arith.constant 0 : index
    %c0_70 = arith.constant 0 : index
    %143 = vector.load %arg16[%c0_68, %c0_69, %c0_70] : memref<1x1x32xf32, #tpu.memory_space<vmem>>, vector<1x1x32xf32>
    %144 = vector.shape_cast %143 : vector<1x1x32xf32> to vector<1x32xf32>
    %145 = vector.broadcast %144 : vector<1x32xf32> to vector<16x32xf32>
    %146 = arith.addf %142, %145 : vector<16x32xf32>
    %cst_71 = arith.constant 0.000000e+00 : f32
    %147 = vector.broadcast %cst_71 : f32 to vector<16x32xf32>
    %148 = arith.maximumf %146, %147 : vector<16x32xf32>
    %c0_72 = arith.constant 0 : index
    %c0_73 = arith.constant 0 : index
    %c0_74 = arith.constant 0 : index
    %149 = vector.load %arg17[%c0_72, %c0_73, %c0_74] : memref<1x32x32xbf16, #tpu.memory_space<vmem>>, vector<1x32x32xbf16>
    %150 = vector.shape_cast %149 : vector<1x32x32xbf16> to vector<32x32xbf16>
    %151 = arith.truncf %148 : vector<16x32xf32> to vector<16x32xbf16>
    %cst_75 = arith.constant dense<0.000000e+00> : vector<16x32xf32>
    %152 = tpu.matmul %151, %150, %cst_75 {dimension_numbers = #tpu.dot_dimension_numbers<[1], [0], [0], [1], [0, 0, 1, 1], [], []>} : vector<16x32xbf16>, vector<32x32xbf16>, vector<16x32xf32> -> vector<16x32xf32>
    %c0_76 = arith.constant 0 : index
    %c0_77 = arith.constant 0 : index
    %c0_78 = arith.constant 0 : index
    %153 = vector.load %arg18[%c0_76, %c0_77, %c0_78] : memref<1x1x32xf32, #tpu.memory_space<vmem>>, vector<1x1x32xf32>
    %154 = vector.shape_cast %153 : vector<1x1x32xf32> to vector<1x32xf32>
    %155 = vector.broadcast %154 : vector<1x32xf32> to vector<16x32xf32>
    %156 = arith.addf %152, %155 : vector<16x32xf32>
    %157 = arith.addf %138, %156 : vector<16x32xf32>
    %c0_79 = arith.constant 0 : index
    %c0_80 = arith.constant 0 : index
    %158 = vector.load %arg2[%c0_79, %c0_80] : memref<16x1xf32, #tpu.memory_space<vmem>>, vector<16x1xf32>
    %159 = vector.broadcast %158 : vector<16x1xf32> to vector<16x32xf32>
    %160 = arith.mulf %157, %159 : vector<16x32xf32>
    %c0_81 = arith.constant 0 : index
    %c0_82 = arith.constant 0 : index
    %161 = vector.load %arg22[%c0_81, %c0_82] : memref<16x32xf32, #tpu.memory_space<vmem>>, vector<16x32xf32>
    tpu.vector_store %arg22[%c0_81, %c0_82], %160 {strides = array<i32>} : memref<16x32xf32, #tpu.memory_space<vmem>>, vector<16x32xf32>,
    %c1_i32 = arith.constant 1 : i32
    %162 = arith.cmpi eq, %arg0, %c1_i32 : i32
    %163 = arith.extui %162 : i1 to i32
    %c0_i32_83 = arith.constant 0 : i32
    %164 = arith.cmpi ne, %163, %c0_i32_83 : i32
    scf.if %164 {
      %c0_84 = arith.constant 0 : index
      %c0_85 = arith.constant 0 : index
      %165 = vector.load %arg22[%c0_84, %c0_85] : memref<16x32xf32, #tpu.memory_space<vmem>>, vector<16x32xf32>
      %c0_86 = arith.constant 0 : index
      %c0_87 = arith.constant 0 : index
      %166 = vector.load %arg19[%c0_86, %c0_87] : memref<1x32xf32, #tpu.memory_space<vmem>>, vector<1x32xf32>
      %c0_88 = arith.constant 0 : index
      %c0_89 = arith.constant 0 : index
      %167 = vector.load %arg20[%c0_88, %c0_89] : memref<1x32xf32, #tpu.memory_space<vmem>>, vector<1x32xf32>
      %cst_90 = arith.constant dense<0.000000e+00> : vector<16xf32>
      %168 = vector.multi_reduction <add>, %165, %cst_90 [1] : vector<16x32xf32> to vector<16xf32>
      %169 = vector.shape_cast %168 : vector<16xf32> to vector<16x1xf32>
      %cst_91 = arith.constant 3.200000e+01 : f32
      %170 = vector.broadcast %cst_91 : f32 to vector<16x1xf32>
      %171 = arith.divf %169, %170 : vector<16x1xf32>
      %172 = vector.broadcast %171 : vector<16x1xf32> to vector<16x32xf32>
      %173 = arith.subf %165, %172 : vector<16x32xf32>
      %174 = arith.mulf %173, %173 : vector<16x32xf32>
      %cst_92 = arith.constant dense<0.000000e+00> : vector<16xf32>
      %175 = vector.multi_reduction <add>, %174, %cst_92 [1] : vector<16x32xf32> to vector<16xf32>
      %176 = vector.shape_cast %175 : vector<16xf32> to vector<16x1xf32>
      %cst_93 = arith.constant 3.200000e+01 : f32
      %177 = vector.broadcast %cst_93 : f32 to vector<16x1xf32>
      %178 = arith.divf %176, %177 : vector<16x1xf32>
      %179 = vector.broadcast %171 : vector<16x1xf32> to vector<16x32xf32>
      %180 = arith.subf %165, %179 : vector<16x32xf32>
      %cst_94 = arith.constant 9.99999993E-9 : f32
      %181 = vector.broadcast %cst_94 : f32 to vector<16x1xf32>
      %182 = arith.addf %178, %181 : vector<16x1xf32>
      %183 = math.rsqrt %182 : vector<16x1xf32>
      %184 = vector.broadcast %183 : vector<16x1xf32> to vector<16x32xf32>
      %185 = arith.mulf %180, %184 : vector<16x32xf32>
      %186 = vector.broadcast %166 : vector<1x32xf32> to vector<16x32xf32>
      %187 = arith.mulf %185, %186 : vector<16x32xf32>
      %188 = vector.broadcast %167 : vector<1x32xf32> to vector<16x32xf32>
      %189 = arith.addf %187, %188 : vector<16x32xf32>
      %c0_95 = arith.constant 0 : index
      %c0_96 = arith.constant 0 : index
      %190 = vector.load %arg3[%c0_95, %c0_96] : memref<16x32xf32, #tpu.memory_space<vmem>>, vector<16x32xf32>
      %191 = arith.mulf %189, %190 : vector<16x32xf32>
      %cst_97 = arith.constant dense<0.000000e+00> : vector<16xf32>
      %192 = vector.multi_reduction <add>, %191, %cst_97 [1] : vector<16x32xf32> to vector<16xf32>
      %193 = vector.shape_cast %192 : vector<16xf32> to vector<16x1xf32>
      %c0_98 = arith.constant 0 : index
      %c0_99 = arith.constant 0 : index
      %194 = vector.load %arg4[%c0_98, %c0_99] : memref<16x32xf32, #tpu.memory_space<vmem>>, vector<16x32xf32>
      %195 = arith.mulf %189, %194 : vector<16x32xf32>
      %cst_100 = arith.constant dense<0.000000e+00> : vector<16xf32>
      %196 = vector.multi_reduction <add>, %195, %cst_100 [1] : vector<16x32xf32> to vector<16xf32>
      %197 = vector.shape_cast %196 : vector<16xf32> to vector<16x1xf32>
      %198 = tpu.concatenate %193, %197 in 1 : vector<16x1xf32>, vector<16x1xf32> -> vector<16x2xf32>
      %c0_101 = arith.constant 0 : index
      %c0_102 = arith.constant 0 : index
      %199 = vector.load %arg21[%c0_101, %c0_102] : memref<16x2xf32, #tpu.memory_space<vmem>>, vector<16x2xf32>
      tpu.vector_store %arg21[%c0_101, %c0_102], %198 {strides = array<i32>} : memref<16x2xf32, #tpu.memory_space<vmem>>, vector<16x2xf32>,
    } else {
    }
    return
  }
  func.func @transform_0(%arg0: i32) -> (i32, i32) {
    %c0_i32 = arith.constant 0 : i32
    %c0_i32_0 = arith.constant 0 : i32
    %c0_i32_1 = arith.constant 0 : i32
    return %c0_i32, %c0_i32_0 : i32, i32
  }
  func.func @transform_1(%arg0: i32) -> (i32, i32) {
    %c0_i32 = arith.constant 0 : i32
    %c0_i32_0 = arith.constant 0 : i32
    %c0_i32_1 = arith.constant 0 : i32
    return %c0_i32, %c0_i32_0 : i32, i32
  }
  func.func @transform_2(%arg0: i32) -> (i32, i32) {
    %c0_i32 = arith.constant 0 : i32
    %c0_i32_0 = arith.constant 0 : i32
    %c0_i32_1 = arith.constant 0 : i32
    return %c0_i32, %c0_i32_0 : i32, i32
  }
  func.func @transform_3(%arg0: i32) -> (i32, i32) {
    %c0_i32 = arith.constant 0 : i32
    %c0_i32_0 = arith.constant 0 : i32
    %c0_i32_1 = arith.constant 0 : i32
    return %c0_i32, %c0_i32_0 : i32, i32
  }
  func.func @transform_4(%arg0: i32) -> (i32, i32, i32) {
    %c0_i32 = arith.constant 0 : i32
    %c0_i32_0 = arith.constant 0 : i32
    %c0_i32_1 = arith.constant 0 : i32
    return %arg0, %c0_i32, %c0_i32_0 : i32, i32, i32
  }
  func.func @transform_5(%arg0: i32) -> (i32, i32, i32) {
    %c0_i32 = arith.constant 0 : i32
    %c0_i32_0 = arith.constant 0 : i32
    %c0_i32_1 = arith.constant 0 : i32
    return %arg0, %c0_i32, %c0_i32_0 : i32, i32, i32
  }
  func.func @transform_6(%arg0: i32) -> (i32, i32, i32) {
    %c0_i32 = arith.constant 0 : i32
    %c0_i32_0 = arith.constant 0 : i32
    %c0_i32_1 = arith.constant 0 : i32
    return %arg0, %c0_i32, %c0_i32_0 : i32, i32, i32
  }
  func.func @transform_7(%arg0: i32) -> (i32, i32, i32) {
    %c0_i32 = arith.constant 0 : i32
    %c0_i32_0 = arith.constant 0 : i32
    %c0_i32_1 = arith.constant 0 : i32
    return %arg0, %c0_i32, %c0_i32_0 : i32, i32, i32
  }
  func.func @transform_8(%arg0: i32) -> (i32, i32, i32) {
    %c0_i32 = arith.constant 0 : i32
    %c0_i32_0 = arith.constant 0 : i32
    %c0_i32_1 = arith.constant 0 : i32
    return %arg0, %c0_i32, %c0_i32_0 : i32, i32, i32
  }
  func.func @transform_9(%arg0: i32) -> (i32, i32, i32) {
    %c0_i32 = arith.constant 0 : i32
    %c0_i32_0 = arith.constant 0 : i32
    %c0_i32_1 = arith.constant 0 : i32
    return %arg0, %c0_i32, %c0_i32_0 : i32, i32, i32
  }
  func.func @transform_10(%arg0: i32) -> (i32, i32, i32) {
    %c0_i32 = arith.constant 0 : i32
    %c0_i32_0 = arith.constant 0 : i32
    %c0_i32_1 = arith.constant 0 : i32
    return %arg0, %c0_i32, %c0_i32_0 : i32, i32, i32
  }
  func.func @transform_11(%arg0: i32) -> (i32, i32, i32) {
    %c0_i32 = arith.constant 0 : i32
    %c0_i32_0 = arith.constant 0 : i32
    %c0_i32_1 = arith.constant 0 : i32
    return %arg0, %c0_i32, %c0_i32_0 : i32, i32, i32
  }
  func.func @transform_12(%arg0: i32) -> (i32, i32, i32) {
    %c0_i32 = arith.constant 0 : i32
    %c0_i32_0 = arith.constant 0 : i32
    %c0_i32_1 = arith.constant 0 : i32
    return %arg0, %c0_i32, %c0_i32_0 : i32, i32, i32
  }
  func.func @transform_13(%arg0: i32) -> (i32, i32, i32) {
    %c0_i32 = arith.constant 0 : i32
    %c0_i32_0 = arith.constant 0 : i32
    %c0_i32_1 = arith.constant 0 : i32
    return %arg0, %c0_i32, %c0_i32_0 : i32, i32, i32
  }
  func.func @transform_14(%arg0: i32) -> (i32, i32, i32) {
    %c0_i32 = arith.constant 0 : i32
    %c0_i32_0 = arith.constant 0 : i32
    %c0_i32_1 = arith.constant 0 : i32
    return %arg0, %c0_i32, %c0_i32_0 : i32, i32, i32
  }
  func.func @transform_15(%arg0: i32) -> (i32, i32, i32) {
    %c0_i32 = arith.constant 0 : i32
    %c0_i32_0 = arith.constant 0 : i32
    %c0_i32_1 = arith.constant 0 : i32
    return %arg0, %c0_i32, %c0_i32_0 : i32, i32, i32
  }
  func.func @transform_16(%arg0: i32) -> (i32, i32, i32) {
    %c0_i32 = arith.constant 0 : i32
    %c0_i32_0 = arith.constant 0 : i32
    %c0_i32_1 = arith.constant 0 : i32
    return %arg0, %c0_i32, %c0_i32_0 : i32, i32, i32
  }
  func.func @transform_17(%arg0: i32) -> (i32, i32, i32) {
    %c0_i32 = arith.constant 0 : i32
    %c0_i32_0 = arith.constant 0 : i32
    %c0_i32_1 = arith.constant 0 : i32
    return %arg0, %c0_i32, %c0_i32_0 : i32, i32, i32
  }
  func.func @transform_18(%arg0: i32) -> (i32, i32) {
    %c0_i32 = arith.constant 0 : i32
    %c0_i32_0 = arith.constant 0 : i32
    %c0_i32_1 = arith.constant 0 : i32
    return %c0_i32, %c0_i32_0 : i32, i32
  }
  func.func @transform_19(%arg0: i32) -> (i32, i32) {
    %c0_i32 = arith.constant 0 : i32
    %c0_i32_0 = arith.constant 0 : i32
    %c0_i32_1 = arith.constant 0 : i32
    return %c0_i32, %c0_i32_0 : i32, i32
  }
  func.func @transform_20(%arg0: i32) -> (i32, i32) {
    %c0_i32 = arith.constant 0 : i32
    %c0_i32_0 = arith.constant 0 : i32
    %c0_i32_1 = arith.constant 0 : i32
    return %c0_i32, %c0_i32_0 : i32, i32
  }
}

</mosaic_0001>

<bundles_post_ra>
// kernel: tpu_custom_call.1
= control target key start
LH: loop header
LB: loop body
LE: loop exit
PB: predicated region body
PF: predicated region fallthrough
CT: control target
= control target key end

     0   :  { %s3679_s0 = inlined_call_operand.hbm [shape: f32[16,32], index: 0, kind: input, shape index: {}]   ;;  %s3680_s1 = inlined_call_operand.vmem [shape: f32[16,1], index: 1, kind: input, shape index: {}]   ;;  %s3681_s2 = inlined_call_operand.hbm [shape: f32[16,32], index: 2, kind: input, shape index: {}]   ;;  %s3682_s3 = inlined_call_operand.hbm [shape: f32[16,32], index: 3, kind: input, shape index: {}]   ;;  %s3683_s4 = inlined_call_operand.vmem [shape: f32[2,1,32], index: 4, kind: input, shape index: {}]   ;;  %s3684_s5 = inlined_call_operand.hbm [shape: f32[2,1,32], index: 5, kind: input, shape index: {}]   ;;  %s3685_s6 = inlined_call_operand.hbm [shape: bf16[2,32,32], index: 6, kind: input, shape index: {}]   ;;  %s3686_s7 = inlined_call_operand.hbm [shape: f32[2,1,32], index: 7, kind: input, shape index: {}]   ;;  %s3687_s8 = inlined_call_operand.hbm [shape: bf16[2,32,64], index: 8, kind: input, shape index: {}]   ;;  %s3688_s9 = inlined_call_operand.hbm [shape: f32[2,1,64], index: 9, kind: input, shape index: {}]   ;;  %s3689_s10 = inlined_call_operand.vmem [shape: bf16[2,32,32], index: 10, kind: input, shape index: {}]   ;;  %s3690_s11 = inlined_call_operand.vmem [shape: f32[2,1,32], index: 11, kind: input, shape index: {}]   ;;  %s3691_s12 = inlined_call_operand.vmem [shape: f32[2,1,32], index: 12, kind: input, shape index: {}]   ;;  %s3692_s13 = inlined_call_operand.vmem [shape: f32[2,1,32], index: 13, kind: input, shape index: {}]   ;;  %s3693_s14 = inlined_call_operand.hbm [shape: bf16[2,32,32], index: 14, kind: input, shape index: {}]   ;;  %s3694_s15 = inlined_call_operand.vmem [shape: f32[2,1,32], index: 15, kind: input, shape index: {}]   ;;  %s3695_s16 = inlined_call_operand.hbm [shape: bf16[2,32,32], index: 16, kind: input, shape index: {}]   ;;  %s3696_s17 = inlined_call_operand.vmem [shape: f32[2,1,32], index: 17, kind: input, shape index: {}]   ;;  %s3697_s18 = inlined_call_operand.vmem [shape: f32[1,32], index: 18, kind: input, shape index: {}]   ;;  %s3698_s19 = inlined_call_operand.vmem [shape: f32[1,32], index: 19, kind: input, shape index: {}]   ;;  %s3699_s20 = inlined_call_operand.vmem [shape: f32[16,2], index: 20, kind: output, shape index: {}]  }
   0x1   :  { %3717 = sst [smem:[#allocation29_spill]] %s3679_s0 }
   0x2   :  { %3718 = sst [smem:[#allocation30_spill]] %s3680_s1 }
   0x3   :  { %3719 = sst [smem:[#allocation31_spill]] %s3681_s2 }
   0x4   :  { %3720 = sst [smem:[#allocation32_spill]] %s3682_s3 }
   0x5   :  { %3721 = sst [smem:[#allocation33_spill]] %s3683_s4 }
   0x6   :  { %3722 = sst [smem:[#allocation34_spill]] %s3684_s5 }
   0x7   :  { %3723 = sst [smem:[#allocation35_spill]] %s3685_s6 }
   0x8   :  { %3724 = sst [smem:[#allocation36_spill]] %s3686_s7 }
   0x9   :  { %3725 = sst [smem:[#allocation37_spill]] %s3690_s11 }
   0xa   :  { %3726 = sst [smem:[#allocation38_spill]] %s3691_s12 }
   0xb   :  { %3727 = sst [smem:[#allocation39_spill]] %s3692_s13 }
   0xc   :  { %3728 = sst [smem:[#allocation40_spill]] %s3694_s15 }
   0xd   :  { %3729 = sst [smem:[#allocation41_spill]] %s3696_s17 }
   0xe   :  { %3730 = sst [smem:[#allocation42_spill]] %s3697_s18 }
   0xf   :  { %3731 = sst [smem:[#allocation43_spill]] %s3698_s19 }
  0x10   :  { %3732 = sst [smem:[#allocation44_spill]] %s3699_s20 }
  0x11   :  { %25 = vsyncpa [#allocation5], 0 }
  0x12   :  { %26 = vsyncpa [#allocation7], 0 }
  0x13   :  { %27 = vsyncpa [#allocation10], 0 }
  0x14   :  { %29 = vsyncpa [#allocation10 + $0x1], 0 }
  0x15   :  { %30 = vsyncpa [#allocation13], 0 }
  0x16   :  { %32 = vsyncpa [#allocation13 + $0x1], 0 }
  0x17   :  { %33 = vsyncpa [#allocation16], 0 }
  0x18   :  { %35 = vsyncpa [#allocation16 + $0x1], 0 }
  0x19   :  { %36 = vsyncpa [#allocation19], 0 }
  0x1a   :  { %38 = vsyncpa [#allocation19 + $0x1], 0  ;;  %s3061_s1 = smov 0   ;;  %s3063_s22 = smov 0  }
  0x1b   :  { %s3065_s23 = smov 0   ;;  %s3067_s24 = smov 0  }
  0x1c LB: > { %3733 = sst [smem:[#allocation26_spill]] %s2929_s23  ;;  %s3080_s2 = sadd.s32 4294967295, %s2933_s24   ;;  %s2933_s24 = sphi %s3067_s24, %s3791_s24   ;;  %s2929_s23 = sphi %s3065_s23, %s3793_s23   ;;  %s2925_s22 = sphi %s3063_s22, %s3795_s22   ;;  %s2921_s1 = sphi %s3061_s1, %s3794_s1  }
  0x1d   : > { %p174_p0 = scmp.ne.s32.totalorder %s2925_s22, %s2921_s1  ;;  %p3709_p1 = scmp.eq.s32.totalorder %s3080_s2, 0 }
  0x1e   : > { %p2262_p2 = scmp.ge.s32.totalorder %s2933_s24, 1  ;;  %p560_p3 = scmp.lt.s32.totalorder %s2933_s24, 3 }
  0x1f   : > { %p3089_p5 = por %p3709_p1, %p174_p0  ;;  %s2935_s26 = smov [#allocation6]  }
  0x20   : > { %p3093_p6 = pnand %p2262_p2, %p560_p3  ;;  %s588_s27 = sshll.u32 %s2935_s26, 4  ;;  %s589_s27 = int_to_ptr.vmem [resolvable:$true] %s588_s27 }
  0x21   : > { %s3734_s25 = scalar_select %p3089_p5, 1, 0 }
  0x22   : > { %s3735_s3 = scalar_select %p3093_p6, 1, 0 }
  0x23   : > { %p2480_p7 = pneg %p3093_p6  ;;  %s3106_s4 = sadd.s32 1, %s2933_s24  }
  0x24   : > { %3737 = sst [smem:[#allocation27_spill]] %s3106_s4  ;;  %s161_s29 = sadd.s32 1, %s2929_s23 }
  0x25   : > { %p3101_p8 = pnand %p2480_p7, %p3709_p1  ;;  %s158_s30 = ssub.s32 %s2933_s24, %s3106_s4 }
  0x26   : > { %s2616_s0 = scalar_lea.vmem %s589_s27, 256  ;;  %p2624_p13 = scmp.lt.s32.totalorder %s589_s27, %s589_s27 }
  0x27   : > { %s3736_s28 = scalar_select %p3101_p8, 1, 0 }
  0x28   : > { %p3710_p9 = pneg %p3101_p8  ;;  %p2617_p10 = scmp.ne.s32.totalorder %s589_s27, %s2616_s0 }
  0x29   : > { %p2625_p0 = scmp.lt.s32.totalorder %s2616_s0, %s2616_s0 }
  0x2a   : > { %p2619_p11 = pnand %p2617_p10, %p3710_p9 }
  0x2b   : > { %p2626_p2 = por %p2625_p0, %p2624_p13 }
  0x2c   : > { %p2620_p12 = pneg %p2619_p11 }
  0x2e   : > { %p2627_p3 = pnand %p2626_p2, %p2620_p12 }
  0x30   : > { %2630 = shalt.err (!%p2627_p3)
}
  0x31   : > { %s3704_s21 = smov 128   ;;  %s3706_s1 = smov 8  }
  0x32   : > { %s3738_s4 = sld [smem:[#allocation31_spill]]  ;;  %p159_p7 = scmp.eq.s32.totalorder %s158_s30, 0 }
  0x33   : > { %p168_p10 = scmp.ne.s32.totalorder %s2929_s23, %s2925_s22  ;;  %p169_p11 = scmp.eq.s32.totalorder %s2933_s24, 0 }
  0x34   : > { %p2515_p12 = scmp.lt.s32.totalorder %s2933_s24, 2  ;;  %s3132_s19 = sand.u32 1, %s2933_s24  }
  0x35   : > { %s3129_s20 = scalar_select %p159_p7, %s2929_s23, %s161_s29  }
  0x36   : > { %p170_p13 = por %p169_p11, %p168_p10  ;;  %s3135_s18 = sand.u32 1, %s2929_s23  }
  0x37   : > { %3739 = sst [smem:[#allocation28_spill]] %s3129_s20  ;;  %s3138_s17 = sshll.u32 %s2933_s24, 4 }
  0x38   : > { %2486 = dma.hbm_to_vmem [thread:$0]  (!%p3101_p8), %s3738_s4, 256, %s589_s27, [#allocation7], %s3704_s21, %s3704_s21, %s3706_s1  }
  0x39   : > { %s3740_s5 = sld [smem:[#allocation34_spill]]  ;;  %s630_s4 = scalar_lea.vmem [#allocation9], %s3135_s18 }
  0x3a   : > { %s637_s29 = sshll.u32 %s630_s4, 4  ;;  %p3149_p0 = pnand %p2515_p12, %p170_p13  ;;  %s3147_s29 = int_to_ptr.vmem [resolvable:$true] %s637_s29 }
  0x3b   : > { %s3742_s7 = sld [smem:[#allocation36_spill]] }
  0x3c   : > { %p3164_p3 = pneg %p3149_p0 }
  0x3f   : > { %s3144_s27 = scalar_lea.hbm %s3740_s5, %s3138_s17  ;;  %s2636_s23 = scalar_lea.hbm %s3740_s5, 32 }
  0x40   : > { %s2631_s15 = scalar_lea.hbm %s3144_s27, 16  ;;  %p2637_p11 = scmp.lt.s32.totalorder %s3144_s27, %s3740_s5 }
  0x41   : > { %s3157_s21 = scalar_lea.hbm %s3742_s7, %s3138_s17  ;;  %p2632_p2 = scmp.ne.s32.totalorder %s3144_s27, %s2631_s15 }
  0x42   : > { %p2638_p12 = scmp.lt.s32.totalorder %s2636_s23, %s2631_s15 }
  0x43   : > { %p2634_p7 = pnand %p3164_p3, %p2632_p2 }
  0x44   : > { %p2639_p13 = por %p2638_p12, %p2637_p11 }
  0x45   : > { %p2635_p10 = pneg %p2634_p7 }
  0x47   : > { %p2640_p4 = pnand %p2639_p13, %p2635_p10 }
  0x49   : > { %2643 = shalt.err (!%p2640_p4)
}
  0x4a   : > { %s2644_s13 = scalar_lea.vmem %s3147_s29, 16  ;;  %s2938_s12 = smov [#allocation9]  }
  0x4b   : > { %p2645_p1 = scmp.ne.s32.totalorder %s3147_s29, %s2644_s13  ;;  %s2649_s20 = sshll.u32 %s2938_s12, 4  ;;  %s2650_s20 = int_to_ptr.vmem [resolvable:$false] %s2649_s20 }
  0x4c   : > { %s2651_s4 = scalar_lea.vmem %s2650_s20, 32  ;;  %p2652_p9 = scmp.lt.s32.totalorder %s3147_s29, %s2650_s20 }
  0x4d   : > { %p2647_p2 = pnand %p2645_p1, %p3164_p3  ;;  %p2653_p5 = scmp.lt.s32.totalorder %s2651_s4, %s2644_s13 }
  0x4f   : > { %p2648_p7 = pneg %p2647_p2  ;;  %p2654_p6 = por %p2653_p5, %p2652_p9 }
  0x51   : > { %p2655_p8 = pnand %p2654_p6, %p2648_p7 }
  0x53   : > { %2658 = shalt.err (!%p2655_p8)
}
  0x54   : > { %s3744_s23 = scalar_lea.sflag [#allocation10], %s3132_s19  ;;  %s668_s12 = scalar_lea.vmem [#allocation12], %s3135_s18 }
  0x55   : > { %2493 = dma.hbm_to_vmem [thread:$0]  (!%p3149_p0), %s3144_s27, 16, %s3147_s29, %s3744_s23  }
  0x56   : > { %s675_s15 = sshll.u32 %s668_s12, 4  ;;  %s3716_s13 = scalar_lea.sflag [#allocation13], %s3132_s19  ;;  %s676_s15 = int_to_ptr.vmem [resolvable:$true] %s675_s15 }
  0x57   : > { %s2659_s26 = scalar_lea.hbm %s3157_s21, 16  ;;  %s2664_s4 = scalar_lea.hbm %s3742_s7, 32 }
  0x58   : > { %p2660_p1 = scmp.ne.s32.totalorder %s3157_s21, %s2659_s26  ;;  %p2665_p6 = scmp.lt.s32.totalorder %s3157_s21, %s3742_s7 }
  0x59   : > { %p2666_p8 = scmp.lt.s32.totalorder %s2664_s4, %s2659_s26 }
  0x5a   : > { %p2662_p4 = pnand %p2660_p1, %p3164_p3 }
  0x5b   : > { %p2667_p9 = por %p2666_p8, %p2665_p6 }
  0x5c   : > { %p2663_p5 = pneg %p2662_p4 }
  0x5e   : > { %p2668_p10 = pnand %p2667_p9, %p2663_p5 }
  0x60   : > { %2671 = shalt.err (!%p2668_p10)
}
  0x61   : > { %s2672_s27 = scalar_lea.vmem %s676_s15, 16  ;;  %s2939_s29 = smov [#allocation12]  }
  0x62   : > { %p2673_p11 = scmp.ne.s32.totalorder %s676_s15, %s2672_s27  ;;  %s2677_s23 = sshll.u32 %s2939_s29, 4  ;;  %s2678_s23 = int_to_ptr.vmem [resolvable:$false] %s2677_s23 }
  0x63   : > { %s2679_s12 = scalar_lea.vmem %s2678_s23, 32  ;;  %p2680_p2 = scmp.lt.s32.totalorder %s676_s15, %s2678_s23 }
  0x64   : > { %p2675_p12 = pnand %p2673_p11, %p3164_p3  ;;  %p2681_p7 = scmp.lt.s32.totalorder %s2679_s12, %s2672_s27 }
  0x66   : > { %p2676_p13 = pneg %p2675_p12  ;;  %p2682_p1 = por %p2681_p7, %p2680_p2 }
  0x68   : > { %p2683_p4 = pnand %p2682_p1, %p2676_p13 }
  0x6a   : > { %2686 = shalt.err (!%p2683_p4)
}
  0x6b   : > { %2499 = dma.hbm_to_vmem [thread:$0]  (!%p3149_p0), %s3157_s21, 16, %s676_s15, %s3716_s13  }
  0x6c   : > { %s3212_s26 = scalar_lea.hbm %s3688_s9, %s3138_s17  ;;  %s706_s0 = scalar_lea.vmem [#allocation15], %s3135_s18 }
  0x6d   : > { %s713_s20 = sshll.u32 %s706_s0, 4  ;;  %s3715_s4 = scalar_lea.sflag [#allocation16], %s3132_s19  ;;  %s714_s20 = int_to_ptr.vmem [resolvable:$true] %s713_s20 }
  0x6e   : > { %s2687_s27 = scalar_lea.hbm %s3212_s26, 16  ;;  %s2692_s21 = scalar_lea.hbm %s3688_s9, 32 }
  0x6f   : > { %p2688_p5 = scmp.ne.s32.totalorder %s3212_s26, %s2687_s27  ;;  %p2693_p9 = scmp.lt.s32.totalorder %s3212_s26, %s3688_s9 }
  0x70   : > { %p2694_p10 = scmp.lt.s32.totalorder %s2692_s21, %s2687_s27 }
  0x71   : > { %p2690_p6 = pnand %p2688_p5, %p3164_p3 }
  0x72   : > { %p2695_p11 = por %p2694_p10, %p2693_p9 }
  0x73   : > { %p2691_p8 = pneg %p2690_p6 }
  0x75   : > { %p2696_p12 = pnand %p2695_p11, %p2691_p8 }
  0x77   : > { %2699 = shalt.err (!%p2696_p12)
}
  0x78   : > { %s2700_s17 = scalar_lea.vmem %s714_s20, 16  ;;  %s2940_s5 = smov [#allocation15]  }
  0x79   : > { %p2701_p13 = scmp.ne.s32.totalorder %s714_s20, %s2700_s17  ;;  %s2705_s11 = sshll.u32 %s2940_s5, 4  ;;  %s2706_s11 = int_to_ptr.vmem [resolvable:$false] %s2705_s11 }
  0x7a   : > { %s2707_s0 = scalar_lea.vmem %s2706_s11, 32  ;;  %p2708_p1 = scmp.lt.s32.totalorder %s714_s20, %s2706_s11 }
  0x7b   : > { %p2703_p2 = pnand %p2701_p13, %p3164_p3  ;;  %p2709_p4 = scmp.lt.s32.totalorder %s2707_s0, %s2700_s17 }
  0x7d   : > { %p2704_p7 = pneg %p2703_p2  ;;  %p2710_p5 = por %p2709_p4, %p2708_p1 }
  0x7f   : > { %p2711_p6 = pnand %p2710_p5, %p2704_p7 }
  0x81   : > { %2714 = shalt.err (!%p2711_p6)
}
  0x82   : > { %2505 = dma.hbm_to_vmem [thread:$0]  (!%p3149_p0), %s3212_s26, 16, %s714_s20, %s3715_s4  }
  0x83   : > { %s2941_s27 = smov [#allocation4]   ;;  %s2942_s23 = smov [#allocation8]  }
  0x84   : > { %s572_s29 = sshll.u32 %s2941_s27, 4  ;;  %s601_s21 = sshll.u32 %s2942_s23, 4  ;;  %s573_s29 = int_to_ptr.vmem [resolvable:$true] %s572_s29  ;;  %s602_s21 = int_to_ptr.vmem [resolvable:$true] %s601_s21 }
  0x85   : > { %s2726_s15 = scalar_lea.vmem %s573_s29, 256  ;;  %p3745_p9 = scmp.ne.s32.totalorder %s3736_s28, 0 }
  0x86   : > { %p2727_p8 = scmp.ne.s32.totalorder %s573_s29, %s2726_s15  ;;  %p2734_p13 = scmp.lt.s32.totalorder %s573_s29, %s573_s29 }
  0x87   : > { %p3746_p10 = pneg %p3745_p9  ;;  %p2735_p2 = scmp.lt.s32.totalorder %s2726_s15, %s2726_s15 }
  0x89   : > { %p2729_p11 = pnand %p2727_p8, %p3746_p10  ;;  %p2736_p7 = por %p2735_p2, %p2734_p13 }
  0x8b   : > { %p2730_p12 = pneg %p2729_p11 }
  0x8d   : > { %p2737_p1 = pnand %p2736_p7, %p2730_p12 }
  0x8f   : > { %2740 = shalt.err (!%p2737_p1)
}
  0x90   : > { %s3747_s12 = smov 8   ;;  %s3748_s26 = smov 128  }
  0x91   : > { %s3749_s5 = sld [smem:[#allocation29_spill]]  ;;  %s3246_s11 = sshll.u32 %s3135_s18, 4 }
  0x92   : > { %s2752_s0 = scalar_lea.vmem %s602_s21, 256  ;;  %p3750_p5 = pmov %p3746_p10 }
  0x93   : > { %p2753_p4 = scmp.ne.s32.totalorder %s602_s21, %s2752_s0  ;;  %p2760_p10 = scmp.lt.s32.totalorder %s602_s21, %s602_s21 }
  0x94   : > { %p2761_p11 = scmp.lt.s32.totalorder %s2752_s0, %s2752_s0 }
  0x95   : > { %p2755_p6 = pnand %p2753_p4, %p3750_p5 }
  0x96   : > { %p2762_p12 = por %p2761_p11, %p2760_p10 }
  0x97   : > { %2483 = dma.hbm_to_vmem [thread:$0]  (!%p3745_p9), %s3749_s5, 256, %s573_s29, [#allocation5], %s3748_s26, %s3748_s26, %s3747_s12  }
  0x98   : > { %p2756_p8 = pneg %p2755_p6 }
  0x9a   : > { %p2763_p13 = pnand %p2762_p12, %p2756_p8 }
  0x9c   : > { %2766 = shalt.err (!%p2763_p13)
}
  0x9d   : > { %s3751_s23 = sld [smem:[#allocation32_spill]]  ;;  %s3260_s15 = sshll.u32 %s2933_s24, 8 }
  0x9e   : > { %s3752_s6 = sld [smem:[#allocation35_spill]]  ;;  %s648_s28 = scalar_lea.vmem [#allocation11], %s3246_s11 }
  0x9f   : > { %s655_s0 = sshll.u32 %s648_s28, 4  ;;  %s3269_s0 = int_to_ptr.vmem [resolvable:$true] %s655_s0 }
  0xa3   : > { %2489 = dma.hbm_to_vmem [thread:$0]  (!%p3745_p9), %s3751_s23, 256, %s602_s21, [#allocation7], %s3748_s26, %s3748_s26, %s3747_s12  }
  0xa4   : > { %s3266_s5 = scalar_lea.hbm %s3752_s6, %s3260_s15  ;;  %s2772_s12 = scalar_lea.hbm %s3752_s6, 512 }
  0xa5   : > { %s2767_s27 = scalar_lea.hbm %s3266_s5, 256  ;;  %p2773_p1 = scmp.lt.s32.totalorder %s3266_s5, %s3752_s6 }
  0xa6   : > { %p2768_p2 = scmp.ne.s32.totalorder %s3266_s5, %s2767_s27  ;;  %p2774_p4 = scmp.lt.s32.totalorder %s2772_s12, %s2767_s27 }
  0xa8   : > { %p2770_p7 = pnand %p2768_p2, %p3164_p3  ;;  %p2775_p5 = por %p2774_p4, %p2773_p1 }
  0xaa   : > { %p2771_p9 = pneg %p2770_p7 }
  0xac   : > { %p2776_p6 = pnand %p2775_p5, %p2771_p9 }
  0xae   : > { %2779 = shalt.err (!%p2776_p6)
}
  0xaf   : > { %s2780_s23 = scalar_lea.vmem %s3269_s0, 256  ;;  %s2943_s20 = smov [#allocation11]  }
  0xb0   : > { %p2781_p8 = scmp.ne.s32.totalorder %s3269_s0, %s2780_s23  ;;  %s2785_s17 = sshll.u32 %s2943_s20, 4  ;;  %s2786_s17 = int_to_ptr.vmem [resolvable:$false] %s2785_s17 }
  0xb1   : > { %s2787_s28 = scalar_lea.vmem %s2786_s17, 512  ;;  %p2788_p12 = scmp.lt.s32.totalorder %s3269_s0, %s2786_s17 }
  0xb2   : > { %p2783_p10 = pnand %p2781_p8, %p3164_p3  ;;  %p2789_p13 = scmp.lt.s32.totalorder %s2787_s28, %s2780_s23 }
  0xb4   : > { %p2784_p11 = pneg %p2783_p10  ;;  %p2790_p2 = por %p2789_p13, %p2788_p12 }
  0xb6   : > { %p2791_p7 = pnand %p2790_p2, %p2784_p11 }
  0xb8   : > { %2794 = shalt.err (!%p2791_p7)
}
  0xb9   : > { %s2944_s27 = smov 64   ;;  %s2945_s24 = smov 4  }
  0xba   : > { %s3753_s21 = scalar_lea.sflag [#allocation10], %s3132_s19  ;;  %s3300_s29 = scalar_lea.hbm %s3687_s8, %s3260_s15 }
  0xbb   : > { %2496 = dma.hbm_to_vmem [thread:$0]  (!%p3149_p0), %s3266_s5, 256, %s3269_s0, %s3753_s21, %s2944_s27, %s2944_s27, %s2945_s24  }
  0xbc   : > { %s686_s23 = scalar_lea.vmem [#allocation14], %s3246_s11  ;;  %s2795_s17 = scalar_lea.hbm %s3300_s29, 256 }
  0xbd   : > { %s693_s20 = sshll.u32 %s686_s23, 4  ;;  %p2796_p9 = scmp.ne.s32.totalorder %s3300_s29, %s2795_s17  ;;  %s694_s20 = int_to_ptr.vmem [resolvable:$true] %s693_s20 }
  0xbe   : > { %s2800_s5 = scalar_lea.hbm %s3687_s8, 512  ;;  %p2801_p5 = scmp.lt.s32.totalorder %s3300_s29, %s3687_s8 }
  0xbf   : > { %p2798_p1 = pnand %p2796_p9, %p3164_p3  ;;  %p2802_p6 = scmp.lt.s32.totalorder %s2800_s5, %s2795_s17 }
  0xc1   : > { %p2799_p4 = pneg %p2798_p1  ;;  %p2803_p8 = por %p2802_p6, %p2801_p5 }
  0xc3   : > { %p2804_p10 = pnand %p2803_p8, %p2799_p4 }
  0xc5   : > { %2807 = shalt.err (!%p2804_p10)
}
  0xc6   : > { %s2808_s12 = scalar_lea.vmem %s694_s20, 256  ;;  %s2946_s26 = smov [#allocation14]  }
  0xc7   : > { %p2809_p11 = scmp.ne.s32.totalorder %s694_s20, %s2808_s12  ;;  %s2813_s23 = sshll.u32 %s2946_s26, 4  ;;  %s2814_s23 = int_to_ptr.vmem [resolvable:$false] %s2813_s23 }
  0xc8   : > { %s2815_s13 = scalar_lea.vmem %s2814_s23, 512  ;;  %p2816_p2 = scmp.lt.s32.totalorder %s694_s20, %s2814_s23 }
  0xc9   : > { %p2811_p12 = pnand %p2809_p11, %p3164_p3  ;;  %p2817_p7 = scmp.lt.s32.totalorder %s2815_s13, %s2808_s12 }
  0xcb   : > { %p2812_p13 = pneg %p2811_p12  ;;  %p2818_p9 = por %p2817_p7, %p2816_p2 }
  0xcd   : > { %p2819_p1 = pnand %p2818_p9, %p2812_p13 }
  0xcf   : > { %2822 = shalt.err (!%p2819_p1)
}
  0xd0   : > { %s3754_s4 = scalar_lea.sflag [#allocation13], %s3132_s19  ;;  %s3328_s5 = scalar_lea.hbm %s3693_s14, %s3260_s15 }
  0xd1   : > { %2502 = dma.hbm_to_vmem [thread:$0]  (!%p3149_p0), %s3300_s29, 256, %s694_s20, %s3754_s4, %s2944_s27, %s2944_s27, %s2945_s24  }
  0xd2   : > { %s750_s13 = scalar_lea.vmem [#allocation17], %s3246_s11  ;;  %s2823_s21 = scalar_lea.hbm %s3328_s5, 256 }
  0xd3   : > { %s757_s0 = sshll.u32 %s750_s13, 4  ;;  %p2824_p4 = scmp.ne.s32.totalorder %s3328_s5, %s2823_s21  ;;  %s758_s0 = int_to_ptr.vmem [resolvable:$true] %s757_s0 }
  0xd4   : > { %s2828_s29 = scalar_lea.hbm %s3693_s14, 512  ;;  %p2829_p8 = scmp.lt.s32.totalorder %s3328_s5, %s3693_s14 }
  0xd5   : > { %p2826_p5 = pnand %p2824_p4, %p3164_p3  ;;  %p2830_p10 = scmp.lt.s32.totalorder %s2828_s29, %s2823_s21 }
  0xd7   : > { %p2827_p6 = pneg %p2826_p5  ;;  %p2831_p11 = por %p2830_p10, %p2829_p8 }
  0xd9   : > { %p2832_p12 = pnand %p2831_p11, %p2827_p6 }
  0xdb   : > { %2835 = shalt.err (!%p2832_p12)
}
  0xdc   : > { %s2836_s4 = scalar_lea.vmem %s758_s0, 256  ;;  %s2947_s17 = smov [#allocation17]  }
  0xdd   : > { %p2837_p13 = scmp.ne.s32.totalorder %s758_s0, %s2836_s4  ;;  %s2841_s28 = sshll.u32 %s2947_s17, 4  ;;  %s2842_s28 = int_to_ptr.vmem [resolvable:$false] %s2841_s28 }
  0xde   : > { %s2843_s13 = scalar_lea.vmem %s2842_s28, 512  ;;  %p2844_p9 = scmp.lt.s32.totalorder %s758_s0, %s2842_s28 }
  0xdf   : > { %p2839_p2 = pnand %p2837_p13, %p3164_p3  ;;  %p2845_p1 = scmp.lt.s32.totalorder %s2843_s13, %s2836_s4 }
  0xe1   : > { %p2840_p7 = pneg %p2839_p2  ;;  %p2846_p4 = por %p2845_p1, %p2844_p9 }
  0xe3   : > { %p2847_p5 = pnand %p2846_p4, %p2840_p7 }
  0xe5   : > { %2850 = shalt.err (!%p2847_p5)
}
  0xe6   : > { %s3755_s21 = scalar_lea.sflag [#allocation16], %s3132_s19  ;;  %s3356_s29 = scalar_lea.hbm %s3695_s16, %s3260_s15 }
  0xe7   : > { %2508 = dma.hbm_to_vmem [thread:$0]  (!%p3149_p0), %s3328_s5, 256, %s758_s0, %s3755_s21, %s2944_s27, %s2944_s27, %s2945_s24  }
  0xe8   : > { %s777_s20 = scalar_lea.vmem [#allocation18], %s3246_s11  ;;  %s774_s4 = scalar_lea.sflag [#allocation19], %s3135_s18 }
  0xe9   : > { %s784_s23 = sshll.u32 %s777_s20, 4  ;;  %s2851_s19 = scalar_lea.hbm %s3356_s29, 256  ;;  %s3359_s23 = int_to_ptr.vmem [resolvable:$true] %s784_s23 }
  0xea   : > { %p2852_p6 = scmp.ne.s32.totalorder %s3356_s29, %s2851_s19  ;;  %s2856_s0 = scalar_lea.hbm %s3695_s16, 512 }
  0xeb   : > { %p2857_p11 = scmp.lt.s32.totalorder %s3356_s29, %s3695_s16  ;;  %p2858_p12 = scmp.lt.s32.totalorder %s2856_s0, %s2851_s19 }
  0xec   : > { %p2854_p8 = pnand %p2852_p6, %p3164_p3 }
  0xed   : > { %p2859_p13 = por %p2858_p12, %p2857_p11 }
  0xee   : > { %p2855_p10 = pneg %p2854_p8 }
  0xf0   : > { %p2860_p2 = pnand %p2859_p13, %p2855_p10 }
  0xf2   : > { %2863 = shalt.err (!%p2860_p2)
}
  0xf3   : > { %s2864_s18 = scalar_lea.vmem %s3359_s23, 256  ;;  %s2948_s11 = smov [#allocation18]  }
  0xf4   : > { %p2865_p7 = scmp.ne.s32.totalorder %s3359_s23, %s2864_s18  ;;  %s2869_s13 = sshll.u32 %s2948_s11, 4  ;;  %s2870_s13 = int_to_ptr.vmem [resolvable:$false] %s2869_s13 }
  0xf5   : > { %s2871_s21 = scalar_lea.vmem %s2870_s13, 512  ;;  %p2872_p4 = scmp.lt.s32.totalorder %s3359_s23, %s2870_s13 }
  0xf6   : > { %p2867_p9 = pnand %p2865_p7, %p3164_p3  ;;  %p2873_p5 = scmp.lt.s32.totalorder %s2871_s21, %s2864_s18 }
  0xf8   : > { %p2868_p1 = pneg %p2867_p9  ;;  %p2874_p6 = por %p2873_p5, %p2872_p4 }
  0xfa   : > { %p2875_p8 = pnand %p2874_p6, %p2868_p1 }
  0xfc   : > { %2878 = shalt.err (!%p2875_p8)
}
  0xfd   : > { %2511 = dma.hbm_to_vmem [thread:$0]  (!%p3149_p0), %s3356_s29, 256, %s3359_s23, %s774_s4, %s2944_s27, %s2944_s27, %s2945_s24  }
  0xfe   : > { %p3756_p3 = scmp.ne.s32.totalorder %s3735_s3, 0 }
  0xff   : > { %p3757_p10 = scmp.eq.s32.totalorder (!%p3756_p3), %s3080_s2, 0 }
 0x100   : > { %802 = sbr.rel (%p3756_p3) target bundleno = 3535 (0xdcf), region = 100 }
 0x105   : > { %2896 = dma.done.wait (%p3757_p10), [#allocation5], 256   ;;  %p3758_p11 = pmov %p3757_p10 }
 0x106   : > { %p3759_p12 = pmov %p3757_p10 }
 0x107   : > { %2898 = vsyncadd (%p3758_p11), [#allocation5], 4294967040 }
 0x108   : > { %2900 = dma.done.wait (%p3759_p12), [#allocation7], 512   ;;  %p3760_p13 = pmov %p3757_p10 }
 0x109   : > { %s816_s1 = sand.u32 1, %s3080_s2   ;;  %s3397_s30 = sand.u32 1, %s2925_s22  }
 0x10a   : > { %2902 = vsyncadd (%p3760_p13), [#allocation7], 4294966784  ;;  %s817_s3 = scalar_lea.sflag [#allocation10], %s816_s1  ;;  %p3761_p0 = scmp.ne.s32.totalorder %s3734_s25, 0 }
 0x10c   : > { %2904 = dma.done.wait (%p3761_p0), %s817_s3, 272  }
 0x10d   : > { %2906 = vsyncadd (%p3761_p0), %s817_s3, 4294967024  ;;  %s3405_s24 = sshll.u32 %s3397_s30, 4  ;;  %s834_s26 = scalar_lea.sflag [#allocation13], %s816_s1 }
 0x10e   : > { %2908 = dma.done.wait (%p3761_p0), %s834_s26, 272  }
 0x10f   : > { %2910 = vsyncadd (%p3761_p0), %s834_s26, 4294967024  ;;  %s851_s23 = scalar_lea.sflag [#allocation16], %s816_s1 }
 0x110   : > { %2912 = dma.done.wait (%p3761_p0), %s851_s23, 272  }
 0x111   : > { %2914 = vsyncadd (%p3761_p0), %s851_s23, 4294967024  ;;  %s868_s17 = scalar_lea.sflag [#allocation19], %s3397_s30 }
 0x112   : > { %2916 = dma.done.wait (%p3761_p0), %s868_s17, 256  }
 0x113   : > { %2918 = vsyncadd (%p3761_p0), %s868_s17, 4294967040  ;;  %p973_p2 = scmp.lt.s32.totalorder %s3080_s2, 1  ;;  %s3763_s23 = sld [smem:[#allocation37_spill]] }
 0x114   : > { %s3764_s28 = sld [smem:[#allocation38_spill]]  ;;  %p3768_p7 = scmp.ne.s32.totalorder %s3080_s2, 0 }
 0x115   : > { %s3428_s0 = scalar_select %p973_p2, %s3080_s2, 1 }
 0x116   : > { %s3765_s27 = sld [smem:[#allocation39_spill]] }
 0x117   : > { %s2334_s13 = sshll.u32 %s3428_s0, 4  ;;  %s3766_s11 = sld [smem:[#allocation40_spill]] }
 0x118   : > { %s3438_s1 = scalar_lea.vmem %s3689_s10, %s2334_s13  ;;  %s3767_s13 = sld [smem:[#allocation41_spill]] }
 0x119   : > { %s983_s17 = scalar_lea.vmem %s3763_s23, %s3428_s0 }
 0x11a   : > { %s986_s15 = scalar_lea.vmem %s3764_s28, %s3428_s0  ;;  %1000 = sbr.rel (%p3768_p7) target bundleno = 289 (0x121), region = 144 }
 0x11c   : > { %s989_s12 = scalar_lea.vmem %s3765_s27, %s3428_s0 }
 0x11d   : > { %s992_s6 = scalar_lea.vmem %s3766_s11, %s3428_s0 }
 0x11e   : > { %s995_s25 = scalar_lea.vmem %s3767_s13, %s3428_s0 }
 0x11f   : > { %v1001_v0 = vld [vmem:[#allocation4] sm:$0xff]  ;;  %vm1003_vm0 = vcmask 261120   ;;  %v1002_v1 = vld [vmem:[#allocation4 + $0x8] sm:$0xff] }
 0x120   : > { %1004 = vst.msk [vmem:[#allocation2] sm:$0xff] %vm1003_vm0, %v1001_v0  ;;  %1005 = vst.msk [vmem:[#allocation2 + $0x8] sm:$0xff] %vm1003_vm0, %v1002_v1 }
 0x121 PF: > { %vm1010_vm1 = vcmask 261120   ;;  %s3769_s7 = scalar_lea.vmem [#allocation14], %s3405_s24  ;;  %s3770_s27 = scalar_lea.vmem [#allocation11], %s3405_s24  ;;  %v2949_v18 = vmov 0.0   ;;  %vm2950_vm2 = vmmov 0   ;;  %vm1201_vm3 = vcmask 130048  }
 0x122   : > { %v2567_v16 = vld [vmem:[%s3769_s7 + $0x8] sm:$0xff]   ;;  %2374 = vmatprep.subr.bf16.mxu1 %v2949_v18  ;;  %2378 = vmatprep.mubr.msk.bf16.mxu1 %vm2950_vm2, %v2949_v18  ;;  %s3771_s29 = smov %s3769_s7  ;;  %s3772_s20 = smov %s3770_s27  ;;  %v1190_v61 = vlaneseq  ;;  %vm1296_vm5 = vcmask 64512   ;;  %vm1327_vm6 = vcmask 1043456   ;;  %vm1654_vm7 = vcmask 261248  }
 0x123   : > { %v2569_v17 = vld [vmem:[%s3770_s27 + $0x8] sm:$0xff]   ;;  %2375 = vmatpush3.bf16.msra.mxu1 %v2567_v16  ;;  %2366 = vmatprep.subr.bf16.mxu0 %v2949_v18  ;;  %s3773_s5 = sld [smem:[#allocation33_spill]]  ;;  %s3775_s3 = scalar_lea.vmem [#allocation9], %s3397_s30 }
 0x124   : > { %v2568_v19 = vld [vmem:[%s3771_s29] sm:$0xff]   ;;  %2376 = vmatprep.subr.bf16.mxu1 %v2949_v18  ;;  %2367 = vmatpush3.bf16.msra.mxu0 %v2569_v17  ;;  %s3776_s26 = scalar_lea.vmem [#allocation15], %s3397_s30  ;;  %s3777_s23 = scalar_lea.vmem [#allocation12], %s3397_s30  ;;  %v3523_v62 = vshrl.u32 %v1190_v61, 7  ;;  %v3525_v63 = vand.u32 127, %v1190_v61 }
 0x125   : > { %v2570_v20 = vld [vmem:[%s3772_s20] sm:$0xff]   ;;  %2368 = vmatprep.subr.bf16.mxu0 %v2949_v18  ;;  %2370 = vmatprep.mubr.msk.bf16.mxu0 %vm2950_vm2, %v2949_v18  ;;  %s2951_s30 = smov 96   ;;  %s2952_s28 = smov 112  }
 0x126   : > { %v2294_v34 = vld [vmem:[%s3775_s3] ss:$0 sm:$0xff]  ;;  %vm1194_vm4 = vcmp.ge.s32.totalorder %v3523_v62, %v3525_v63  ;;  %s2953_s18 = smov 80   ;;  %s2954_s21 = smov 16  }
 0x127   : > { %v1006_v2 = vld [vmem:[#allocation2] sm:$0xff]  ;;  %v1007_v3 = vld [vmem:[#allocation2 + $0x8] sm:$0xff]  ;;  %2377 = vmatpush3.bf16.msra.mxu1 %v2568_v19  ;;  %s3783_s3 = scalar_lea.vmem [#allocation18], %s3405_s24  ;;  %p2325_p9 = scmp.ne.s32.totalorder %s3080_s2, 1 }
 0x128   : > { %v1011_v4 = vsel %vm1010_vm1, %v1006_v2, 0.0  ;;  %v1014_v5 = vsel %vm1010_vm1, %v1007_v3, 0.0  ;;  %v1126_v21 = vpack.c.bf16 %v1007_v3, %v1006_v2  ;;  %2369 = vmatpush3.bf16.msra.mxu0 %v2570_v20  ;;  %2388 = vmatprep.subr.bf16.mxu1 %v2949_v18  ;;  %v2299_v39 = vld [vmem:[%s3776_s26] ss:$0 sm:$0xff]  ;;  %s3790_s4 = sld [smem:[#allocation44_spill]] (!%p2325_p9) }
 0x129   : > { %1012 = vadd.xlane.f32.xlu0 %v1011_v4  ;;  %2382 = vmatprep.subr.bf16.mxu0 %v2949_v18  ;;  %s3774_s11 = scalar_lea.vmem %s3773_s5, %s3428_s0  ;;  %v2295_v50 = vld [vmem:[%s3777_s23] ss:$0 sm:$0xff]  ;;  %s3788_s0 = sld [smem:[#allocation42_spill]] (!%p2325_p9) }
 0x12a   : > { %2379 = vmatmul.mubr.msk.bf16.vlgmr.msra.gmra.mxu1 %vm1010_vm1, %v1126_v21  ;;  %v2293_v30 = vld [vmem:[%s3774_s11] ss:$0 sm:$0xff] }
 0x12b   : > { %2390 = vmatprep.mubr.msk.bf16.mxu1 %vm2950_vm2, %v2949_v18 }
 0x12d   : > { %1015 = vadd.xlane.f32.xlu0 %v1014_v5 }
 0x1b2   : > { %v1013_v6 = vpop.xlane.xlu0 %1012 }
 0x1b3   : > { %v1018_v7 = vmul.f32 0.03125, %v1013_v6 }
 0x1b5   : > { %v1020_v8 = vsub.f32 %v1006_v2, %v1018_v7 }
 0x1b6   : > { %v1016_v9 = vpop.xlane.xlu0 %1015 }
 0x1b7   : > { %v1019_v10 = vmul.f32 0.03125, %v1016_v9  ;;  %v1022_v11 = vmul.f32 %v1020_v8, %v1020_v8 }
 0x1b9   : > { %v1021_v12 = vsub.f32 %v1007_v3, %v1019_v10  ;;  %v1024_v13 = vsel %vm1010_vm1, %v1022_v11, 0.0 }
 0x1ba   : > { %1025 = vadd.xlane.f32.xlu1 %v1024_v13 }
 0x1bb   : > { %v1023_v14 = vmul.f32 %v1021_v12, %v1021_v12 }
 0x1bd   : > { %v1027_v15 = vsel %vm1010_vm1, %v1023_v14, 0.0 }
 0x1be   : > { %1028 = vadd.xlane.f32.xlu1 %v1027_v15 }
 0x1ea   : > { %v1183_v40 = vpop.f32.mrf.mxu1 }
 0x1eb   : > { %v1184_v41 = vadd.f32 %v2299_v39, %v1183_v40 }
 0x1ec   : > { %v2380_v42 = vpop.f32.mrf.mxu1 }
 0x1ed   : > { %v3505_v43 = vpack.c.bf16 %v1184_v41, %v1184_v41 }
 0x1ee   : > { %v1186_v44 = vpop.f32.mrf.mxu1 }
 0x1ef   : > { %v1187_v45 = vadd.f32 %v2299_v39, %v1186_v44  ;;  %v1206_v46 = vsel %vm1201_vm3, %v3505_v43, 0 }
 0x1f0   : > { %v2381_v47 = vpop.f32.mrf.mxu1 }
 0x1f1   : > { %v3509_v48 = vpack.c.bf16 %v1187_v45, %v1187_v45 }
 0x1f3   : > { %v1252_v49 = vsel %vm1201_vm3, %v3509_v48, 0 }
 0x1f4   : > { %2389 = vmatpush3.bf16.xpose.msra.mxu1 %v1252_v49 }
 0x1f5   : > { %2400 = vmatprep.subr.bf16.mxu1 %v2949_v18 }
 0x243   : > { %v1026_v22 = vpop.xlane.xlu1 %1025 }
 0x244   : > { %v1030_v23 = vmul.f32 0.03125, %v1026_v22 }
 0x246   : > { %v1032_v24 = vadd.f32 1e-08, %v1030_v23 }
 0x247   : > { %v1029_v25 = vpop.xlane.xlu1 %1028 }
 0x248   : > { %2577 = vrsqrt.f32 %v1032_v24  ;;  %v1031_v26 = vmul.f32 0.03125, %v1029_v25 }
 0x24a   : > { %v1033_v27 = vadd.f32 1e-08, %v1031_v26 }
 0x24c   : > { %2579 = vrsqrt.f32 %v1033_v27 }
 0x255   : > { %v2578_v28 = vpop.eup %2577 }
 0x256   : > { %v1036_v29 = vmul.f32 %v2578_v28, %v1020_v8 }
 0x258   : > { %v1044_v33 = vmul.f32 %v2293_v30, %v1036_v29 }
 0x259   : > { %v2580_v31 = vpop.eup %2579 }
 0x25a   : > { %v1037_v32 = vmul.f32 %v2580_v31, %v1021_v12  ;;  %v3494_v36 = vadd.f32 %v2294_v34, %v1044_v33 }
 0x25c   : > { %v1045_v35 = vmul.f32 %v2293_v30, %v1037_v32 }
 0x25e   : > { %v3496_v37 = vadd.f32 %v2294_v34, %v1045_v35 }
 0x260   : > { %v1058_v38 = vpack.c.bf16 %v3496_v37, %v3494_v36 }
 0x262   : > { %2371 = vmatmul.mubr.msk.bf16.vlgmr.msra.gmra.mxu0 %vm1010_vm1, %v1058_v38 }
 0x263   : > { %2384 = vmatprep.mubr.msk.bf16.mxu0 %vm2950_vm2, %v2949_v18  ;;  %2383 = vmatpush3.bf16.xpose.msra.mxu0 %v1206_v46 }
 0x264   : > { %2394 = vmatprep.subr.bf16.mxu0 %v2949_v18 }
 0x322   : > { %v1115_v51 = vpop.f32.mrf.mxu0 }
 0x323   : > { %v1116_v52 = vadd.f32 %v2295_v50, %v1115_v51 }
 0x324   : > { %v2372_v53 = vpop.f32.mrf.mxu0 }
 0x325   : > { %v1195_v54 = vmul.f32 0.25, %v1116_v52 }
 0x326   : > { %v1118_v55 = vpop.f32.mrf.mxu0 }
 0x327   : > { %v1197_v56 = vpack.c.bf16 %v1195_v54, %v1195_v54  ;;  %v1119_v57 = vadd.f32 %v2295_v50, %v1118_v55 }
 0x328   : > { %v2373_v58 = vpop.f32.mrf.mxu0 }
 0x329   : > { %v1196_v59 = vmul.f32 0.25, %v1119_v57  ;;  %2385 = vmatmul.mubr.msk.bf16.vlgmr.msra.gmra.mxu0 %vm1201_vm3, %v1197_v56 }
 0x32a   : > { %2396 = vmatprep.mubr.msk.bf16.mxu0 %vm2950_vm2, %v2949_v18 }
 0x32b   : > { %v1198_v60 = vpack.c.bf16 %v1196_v59, %v1196_v59 }
 0x32d   : > { %2391 = vmatmul.mubr.msk.bf16.vlgmr.msra.gmra.mxu1 %vm1201_vm3, %v1198_v60 }
 0x32e   : > { %2402 = vmatprep.mubr.msk.bf16.mxu1 %vm2950_vm2, %v2949_v18 }
 0x3e9   : > { %v1242_v0 = vpop.f32.mrf.mxu0 }
 0x3ea   : > { %v1294_v1 = vsel %vm1194_vm4, %v1242_v0, -1e+30 }
 0x3eb   : > { %v2386_v2 = vpop.f32.mrf.mxu0  ;;  %v1297_v3 = vsel %vm1296_vm5, %v1294_v1, -inf }
 0x3ec   : > { %1298 = vmax.xlane.f32.xlu0 %v1297_v3 }
 0x3ed   : > { %v1245_v4 = vpop.f32.mrf.mxu0  ;;  %v1288_v5 = vpop.f32.mrf.mxu1 }
 0x3ee   : > { %v1295_v6 = vsel %vm1194_vm4, %v1288_v5, -1e+30 }
 0x3ef   : > { %v2387_v7 = vpop.f32.mrf.mxu0  ;;  %v2392_v8 = vpop.f32.mrf.mxu1  ;;  %v1300_v9 = vsel %vm1296_vm5, %v1295_v6, -inf }
 0x3f0   : > { %1301 = vmax.xlane.f32.xlu1 %v1300_v9 }
 0x3f1   : > { %v1291_v10 = vpop.f32.mrf.mxu1 }
 0x3f3   : > { %v2393_v11 = vpop.f32.mrf.mxu1 }
 0x401   : > { %1372 = vrot.lane.b32.xlu1 %v3509_v48, %s2951_s30 }
 0x405   : > { %1425 = vrot.lane.b32.xlu1 %v3505_v43, %s2952_s28 }
 0x475   : > { %v1299_v12 = vpop.xlane.xlu0 %1298 }
 0x476   : > { %v1303_v13 = vsub.f32 %v1294_v1, %v1299_v12 }
 0x478   : > { %v1305_v14 = vmul.f32 1.442695, %v1303_v13 }
 0x479   : > { %v1302_v15 = vpop.xlane.xlu1 %1301 }
 0x47a   : > { %2581 = vpow2.f32 %v1305_v14  ;;  %v1304_v16 = vsub.f32 %v1295_v6, %v1302_v15 }
 0x47c   : > { %v1307_v17 = vmul.f32 1.442695, %v1304_v16 }
 0x47d   : > { %v1373_v19 = vpop.permute.xlu1 %1372 }
 0x47e   : > { %2583 = vpow2.f32 %v1307_v17  ;;  %v1378_v20 = vsel %vm1327_vm6, %v1373_v19, 0 }
 0x47f   : > { %2401 = vmatpush3.bf16.msra.mxu1 %v1378_v20 }
 0x480   : > { %2412 = vmatprep.subr.bf16.mxu1 %v2949_v18 }
 0x481   : > { %v1426_v25 = vpop.permute.xlu1 %1425 }
 0x482   : > { %v1431_v34 = vsel %vm1201_vm3, %v1426_v25, 0 }
 0x487   : > { %v2582_v21 = vpop.eup %2581 }
 0x488   : > { %v1309_v22 = vsel %vm1296_vm5, %v2582_v21, 0.0 }
 0x489   : > { %1310 = vadd.xlane.f32.xlu0 %v1309_v22  ;;  %v2571_v22 = vld [vmem:[%s3438_s1 + $0x8] sm:$0xff]  }
 0x48b   : > { %v2584_v23 = vpop.eup %2583 }
 0x48c   : > { %v1312_v24 = vsel %vm1296_vm5, %v2584_v23, 0.0 }
 0x48d   : > { %1313 = vadd.xlane.f32.xlu1 %v1312_v24 }
 0x49e   : > { %1476 = vrot.lane.b32.xlu1 %v3509_v48, %s2952_s28 }
 0x49f   : > { %1322 = vrot.lane.b32.xlu0 %v3505_v43, %s2951_s30  ;;  %s3785_s30 = sld [smem:[#allocation30_spill]] }
 0x4a2   : > { %1474 = vrot.lane.b32.xlu1 %v1198_v60, %s2952_s28 }
 0x4a3   : > { %1423 = vrot.lane.b32.xlu0 %v1197_v56, %s2952_s28 }
 0x512   : > { %v1311_v26 = vpop.xlane.xlu0 %1310 }
 0x513   : > { %2585 = vrcp.f32 %v1311_v26 }
 0x516   : > { %v1314_v27 = vpop.xlane.xlu1 %1313  ;;  %v1323_v28 = vpop.permute.xlu0 %1322 }
 0x517   : > { %2587 = vrcp.f32 %v1314_v27  ;;  %v1329_v29 = vsel %vm1327_vm6, %v1323_v28, 0 }
 0x518   : > { %2395 = vmatpush3.bf16.msra.mxu0 %v1329_v29 }
 0x519   : > { %2406 = vmatprep.subr.bf16.mxu0 %v2949_v18 }
 0x51a   : > { %v1477_v38 = vpop.permute.xlu1 %1476  ;;  %v1424_v41 = vpop.permute.xlu0 %1423 }
 0x51b   : > { %v1482_v40 = vsel %vm1201_vm3, %v1477_v38, 0 }
 0x51e   : > { %v1475_v42 = vpop.permute.xlu1 %1474 }
 0x520   : > { %v2586_v30 = vpop.eup %2585 }
 0x521   : > { %v1317_v31 = vmul.f32 %v2586_v30, %v2582_v21 }
 0x523   : > { %v1319_v32 = vpack.c.bf16 %v1317_v31, %v1317_v31 }
 0x524   : > { %v2588_v33 = vpop.eup %2587 }
 0x525   : > { %2397 = vmatmul.mubr.msk.bf16.vlgmr.msra.gmra.mxu0 %vm1296_vm5, %v1319_v32  ;;  %v1318_v35 = vmul.f32 %v2588_v33, %v2584_v23  ;;  %v2572_v23 = vld [vmem:[%s3438_s1] sm:$0xff]  }
 0x526   : > { %2407 = vmatpush3.bf16.xpose.msra.mxu0 %v1431_v34  ;;  %2408 = vmatprep.mubr.msk.bf16.mxu0 %vm2950_vm2, %v2949_v18 }
 0x527   : > { %v1320_v39 = vpack.c.bf16 %v1318_v35, %v1318_v35  ;;  %2418 = vmatprep.subr.bf16.mxu0 %v2949_v18 }
 0x529   : > { %2403 = vmatmul.mubr.msk.bf16.vlgmr.msra.gmra.mxu1 %vm1296_vm5, %v1320_v39  ;;  %v2311_v39 = vld [vmem:[%s983_s17] ss:$0 sm:$0xff]  ;;  %s3779_s17 = scalar_lea.vmem [#allocation17], %s3405_s24 }
 0x52a   : > { %2413 = vmatpush3.bf16.xpose.msra.mxu1 %v1482_v40  ;;  %2414 = vmatprep.mubr.msk.bf16.mxu1 %vm2950_vm2, %v2949_v18  ;;  %s3780_s27 = smov %s3779_s17 }
 0x52b   : > { %2424 = vmatprep.subr.bf16.mxu1 %v2949_v18 }
 0x52d   : > { %2409 = vmatmul.mubr.msk.bf16.vlgmr.msra.gmra.mxu0 %vm1201_vm3, %v1424_v41 }
 0x52e   : > { %2420 = vmatprep.mubr.msk.bf16.mxu0 %vm2950_vm2, %v2949_v18 }
 0x531   : > { %2415 = vmatmul.mubr.msk.bf16.vlgmr.msra.gmra.mxu1 %vm1201_vm3, %v1475_v42 }
 0x532   : > { %2426 = vmatprep.mubr.msk.bf16.mxu1 %vm2950_vm2, %v2949_v18 }
 0x5e5   : > { %v1365_v44 = vpop.f32.mrf.mxu0 }
 0x5e6   : > { %1420 = vst.msk [vmem:[#allocation3] sm:$0xff] %vm1201_vm3, %v1365_v44 }
 0x5e7   : > { %v2398_v45 = vpop.f32.mrf.mxu0 }
 0x5e9   : > { %v1368_v46 = vpop.f32.mrf.mxu0  ;;  %v1414_v47 = vpop.f32.mrf.mxu1 }
 0x5ea   : > { %1421 = vst.msk [vmem:[#allocation3 + $0x8] sm:$0xff] %vm1201_vm3, %v1414_v47 }
 0x5eb   : > { %v2399_v49 = vpop.f32.mrf.mxu0  ;;  %v2404_v50 = vpop.f32.mrf.mxu1 }
 0x5ed   : > { %v1417_v51 = vpop.f32.mrf.mxu1  ;;  %v1467_v52 = vpop.f32.mrf.mxu0 }
 0x5ee   : > { %v1524_v53 = vsel %vm1194_vm4, %v1467_v52, -1e+30 }
 0x5ef   : > { %v2405_v54 = vpop.f32.mrf.mxu1  ;;  %v2410_v55 = vpop.f32.mrf.mxu0  ;;  %v1526_v56 = vsel %vm1296_vm5, %v1524_v53, -inf }
 0x5f0   : > { %1527 = vmax.xlane.f32.xlu0 %v1526_v56 }
 0x5f1   : > { %v1470_v57 = vpop.f32.mrf.mxu0  ;;  %v1518_v58 = vpop.f32.mrf.mxu1 }
 0x5f2   : > { %v1525_v59 = vsel %vm1194_vm4, %v1518_v58, -1e+30 }
 0x5f3   : > { %v2411_v60 = vpop.f32.mrf.mxu0  ;;  %v2416_v61 = vpop.f32.mrf.mxu1  ;;  %v1529_v0 = vsel %vm1296_vm5, %v1525_v59, -inf }
 0x5f4   : > { %1530 = vmax.xlane.f32.xlu1 %v1529_v0  ;;  %v2574_v61 = vld [vmem:[%s3780_s27] sm:$0xff]   ;;  %s3789_s27 = sld [smem:[#allocation43_spill]] (!%p2325_p9) }
 0x5f5   : > { %v1521_v1 = vpop.f32.mrf.mxu1 }
 0x5f7   : > { %v2417_v2 = vpop.f32.mrf.mxu1 }
 0x605   : > { %1598 = vrot.lane.b32.xlu1 %v3509_v48, %s2953_s18 }
 0x679   : > { %v1528_v3 = vpop.xlane.xlu0 %1527 }
 0x67a   : > { %v1532_v4 = vsub.f32 %v1524_v53, %v1528_v3 }
 0x67c   : > { %v1534_v5 = vmul.f32 1.442695, %v1532_v4 }
 0x67d   : > { %v1531_v6 = vpop.xlane.xlu1 %1530 }
 0x67e   : > { %2589 = vpow2.f32 %v1534_v5  ;;  %v1533_v7 = vsub.f32 %v1525_v59, %v1531_v6 }
 0x680   : > { %v1536_v8 = vmul.f32 1.442695, %v1533_v7 }
 0x681   : > { %v1599_v9 = vpop.permute.xlu1 %1598 }
 0x682   : > { %2591 = vpow2.f32 %v1536_v8  ;;  %v1604_v62 = vsel %vm1327_vm6, %v1599_v9, 0  ;;  %v2315_v8 = vld [vmem:[%s986_s15] ss:$0 sm:$0xff]  ;;  %s3784_s15 = smov %s3783_s3 }
 0x683   : > { %2425 = vmatpush3.bf16.msra.mxu1 %v1604_v62 }
 0x684   : > { %2438 = vmatprep.subr.bf16.mxu1 %v2949_v18 }
 0x68b   : > { %v2590_v63 = vpop.eup %2589 }
 0x68c   : > { %v1538_v10 = vsel %vm1296_vm5, %v2590_v63, 0.0 }
 0x68d   : > { %1539 = vadd.xlane.f32.xlu0 %v1538_v10  ;;  %v2316_v10 = vld [vmem:[%s989_s12] ss:$0 sm:$0xff] }
 0x68f   : > { %v2592_v11 = vpop.eup %2591 }
 0x690   : > { %v1541_v48 = vsel %vm1296_vm5, %v2592_v11, 0.0 }
 0x691   : > { %1542 = vadd.xlane.f32.xlu0 %v1541_v48 }
 0x6a7   : > { %1550 = vrot.lane.b32.xlu0 %v3505_v43, %s2953_s18 }
 0x716   : > { %v1540_v12 = vpop.xlane.xlu0 %1539 }
 0x717   : > { %2593 = vrcp.f32 %v1540_v12 }
 0x71a   : > { %v1543_v13 = vpop.xlane.xlu0 %1542 }
 0x71b   : > { %2595 = vrcp.f32 %v1543_v13 }
 0x71e   : > { %v1551_v14 = vpop.permute.xlu0 %1550 }
 0x71f   : > { %v1556_v15 = vsel %vm1327_vm6, %v1551_v14, 0  ;;  %v2575_v14 = vld [vmem:[%s3783_s3 + $0x8] sm:$0xff]  }
 0x720   : > { %2419 = vmatpush3.bf16.msra.mxu0 %v1556_v15  ;;  %v2576_v15 = vld [vmem:[%s3784_s15] sm:$0xff]  }
 0x721   : > { %2430 = vmatprep.subr.bf16.mxu0 %v2949_v18 }
 0x724   : > { %v2594_v16 = vpop.eup %2593 }
 0x725   : > { %v1546_v17 = vmul.f32 %v2594_v16, %v2590_v63  ;;  %v1913_v16 = vld [vmem:[%s3785_s30] sm:$0xff] }
 0x727   : > { %v1548_v19 = vpack.c.bf16 %v1546_v17, %v1546_v17  ;;  %v1914_v17 = vld [vmem:[%s3785_s30 + $0x8] sm:$0xff] }
 0x728   : > { %v2596_v20 = vpop.eup %2595 }
 0x729   : > { %2421 = vmatmul.mubr.msk.bf16.vlgmr.msra.gmra.mxu0 %vm1296_vm5, %v1548_v19  ;;  %v1547_v21 = vmul.f32 %v2596_v20, %v2592_v11  ;;  %v2955_v19 = vmov 0  }
 0x72a   : > { %2434 = vmatprep.mubr.msk.bf16.mxu0 %vm2950_vm2, %v2949_v18  ;;  %2431 = vmatpush3.bf16.msra.mxu0 %v2571_v22 }
 0x72b   : > { %v1549_v43 = vpack.c.bf16 %v1547_v21, %v1547_v21  ;;  %2432 = vmatprep.subr.bf16.mxu0 %v2949_v18  ;;  %2565 = vset.pattern.permute.xlu0 %v2955_v19 }
 0x72c   : > { %2566 = vset.pattern.permute.xlu1 %v2955_v19 }
 0x72d   : > { %2427 = vmatmul.mubr.msk.bf16.vlgmr.msra.gmra.mxu1 %vm1296_vm5, %v1549_v43 }
 0x72e   : > { %2442 = vmatprep.mubr.msk.bf16.mxu1 %vm2950_vm2, %v2949_v18  ;;  %2433 = vmatpush3.bf16.msra.mxu0 %v2572_v23 }
 0x72f   : > { %2446 = vmatprep.subr.bf16.mxu0 %v2949_v18 }
 0x7e9   : > { %v1592_v24 = vpop.f32.mrf.mxu0 }
 0x7ea   : > { %1648 = vrot.lane.b32.xlu1 %v1592_v24, %s2954_s21 }
 0x7eb   : > { %v2422_v25 = vpop.f32.mrf.mxu0 }
 0x7ed   : > { %v1595_v26 = vpop.f32.mrf.mxu0  ;;  %v1640_v27 = vpop.f32.mrf.mxu1 }
 0x7ee   : > { %1650 = vrot.lane.b32.xlu1 %v1640_v27, %s2954_s21 }
 0x7ef   : > { %v2423_v28 = vpop.f32.mrf.mxu0  ;;  %v2428_v29 = vpop.f32.mrf.mxu1 }
 0x7f0   : > { %v2321_v28 = vld [vmem:[%s995_s25] ss:$0 sm:$0xff] }
 0x7f1   : > { %v1643_v30 = vpop.f32.mrf.mxu1 }
 0x7f3   : > { %v2429_v31 = vpop.f32.mrf.mxu1 }
 0x85c   : > { %v1649_v32 = vpop.permute.xlu1 %1648 }
 0x85d   : > { %1655 = vst.msk [vmem:[#allocation3] sm:$0xff] %vm1654_vm7, %v1649_v32 }
 0x860   : > { %v1651_v33 = vpop.permute.xlu1 %1650 }
 0x861   : > { %1656 = vst.msk [vmem:[#allocation3 + $0x8] sm:$0xff] %vm1654_vm7, %v1651_v33 }
 0x864   : > { %v1657_v34 = vld [vmem:[#allocation3] sm:$0xff] }
 0x868   : > { %v1658_v35 = vld [vmem:[#allocation3 + $0x8] sm:$0xff] }
 0x869   : > { %v1663_v38 = vpack.c.bf16 %v1658_v35, %v1657_v34 }
 0x86b   : > { %2435 = vmatmul.mubr.msk.bf16.vlgmr.msra.gmra.mxu0 %vm1010_vm1, %v1663_v38 }
 0x86c   : > { %2450 = vmatprep.mubr.msk.bf16.mxu0 %vm2950_vm2, %v2949_v18  ;;  %2447 = vmatpush3.bf16.msra.mxu0 %v2575_v14 }
 0x86d   : > { %2448 = vmatprep.subr.bf16.mxu0 %v2949_v18 }
 0x870   : > { %2449 = vmatpush3.bf16.msra.mxu0 %v2576_v15 }
 0x92b   : > { %v1720_v40 = vpop.f32.mrf.mxu0 }
 0x92c   : > { %v1721_v41 = vadd.f32 %v2311_v39, %v1720_v40 }
 0x92d   : > { %v2436_v42 = vpop.f32.mrf.mxu0 }
 0x92e   : > { %v1727_v44 = vadd.f32 %v1721_v41, %v3494_v36 }
 0x92f   : > { %v1723_v45 = vpop.f32.mrf.mxu0 }
 0x930   : > { %v1724_v46 = vadd.f32 %v2311_v39, %v1723_v45  ;;  %v1731_v47 = vsel %vm1010_vm1, %v1727_v44, 0.0 }
 0x931   : > { %1732 = vadd.xlane.f32.xlu0 %v1731_v47  ;;  %v2437_v49 = vpop.f32.mrf.mxu0 }
 0x932   : > { %v1728_v50 = vadd.f32 %v1724_v46, %v3496_v37  ;;  %v2573_v37 = vld [vmem:[%s3779_s17 + $0x8] sm:$0xff]  }
 0x933   : > { %2439 = vmatpush3.bf16.msra.mxu1 %v2573_v37 }
 0x934   : > { %v1734_v51 = vsel %vm1010_vm1, %v1728_v50, 0.0  ;;  %2440 = vmatprep.subr.bf16.mxu1 %v2949_v18  ;;  %v2317_v18 = vld [vmem:[%s992_s6] ss:$0 sm:$0xff] }
 0x935   : > { %1735 = vadd.xlane.f32.xlu1 %v1734_v51 }
 0x937   : > { %2441 = vmatpush3.bf16.msra.mxu1 %v2574_v61 }
 0x946   : > { %1922 = vperm.xlu1 %2566, %v1914_v17  }
 0x9ba   : > { %v1733_v52 = vpop.xlane.xlu0 %1732 }
 0x9bb   : > { %v1737_v53 = vmul.f32 0.03125, %v1733_v52 }
 0x9bd   : > { %v1739_v54 = vsub.f32 %v1727_v44, %v1737_v53 }
 0x9be   : > { %v1736_v55 = vpop.xlane.xlu1 %1735 }
 0x9bf   : > { %v1738_v56 = vmul.f32 0.03125, %v1736_v55  ;;  %v1741_v57 = vmul.f32 %v1739_v54, %v1739_v54 }
 0x9c1   : > { %v1740_v36 = vsub.f32 %v1728_v50, %v1738_v56  ;;  %v1743_v58 = vsel %vm1010_vm1, %v1741_v57, 0.0 }
 0x9c2   : > { %1744 = vadd.xlane.f32.xlu0 %v1743_v58  ;;  %v1923_v40 = vpop.permute.xlu1 %1922 }
 0x9c3   : > { %v1742_v59 = vmul.f32 %v1740_v36, %v1740_v36 }
 0x9c5   : > { %v1746_v60 = vsel %vm1010_vm1, %v1742_v59, 0.0 }
 0x9c6   : > { %1747 = vadd.xlane.f32.xlu0 %v1746_v60 }
 0x9dc   : > { %1917 = vperm.xlu0 %2565, %v1913_v16  }
 0xa4b   : > { %v1745_v0 = vpop.xlane.xlu0 %1744 }
 0xa4c   : > { %v1749_v1 = vmul.f32 0.03125, %v1745_v0 }
 0xa4e   : > { %v1751_v2 = vadd.f32 1e-08, %v1749_v1 }
 0xa4f   : > { %v1748_v3 = vpop.xlane.xlu0 %1747 }
 0xa50   : > { %2597 = vrsqrt.f32 %v1751_v2  ;;  %v1750_v4 = vmul.f32 0.03125, %v1748_v3 }
 0xa52   : > { %v1752_v5 = vadd.f32 1e-08, %v1750_v4 }
 0xa54   : > { %2599 = vrsqrt.f32 %v1752_v5 }
 0xa57   : > { %v1918_v32 = vpop.permute.xlu0 %1917 }
 0xa5d   : > { %v2598_v6 = vpop.eup %2597 }
 0xa5e   : > { %v1755_v7 = vmul.f32 %v2598_v6, %v1739_v54 }
 0xa60   : > { %v1763_v63 = vmul.f32 %v2315_v8, %v1755_v7 }
 0xa61   : > { %v2600_v9 = vpop.eup %2599 }
 0xa62   : > { %v1756_v62 = vmul.f32 %v2600_v9, %v1740_v36  ;;  %v1771_v48 = vadd.f32 %v2316_v10, %v1763_v63 }
 0xa64   : > { %v1764_v11 = vmul.f32 %v2315_v8, %v1756_v62 }
 0xa66   : > { %v1772_v12 = vadd.f32 %v2316_v10, %v1764_v11 }
 0xa68   : > { %v1777_v13 = vpack.c.bf16 %v1772_v12, %v1771_v48 }
 0xa6a   : > { %2443 = vmatmul.mubr.msk.bf16.vlgmr.msra.gmra.mxu1 %vm1010_vm1, %v1777_v13 }
 0xb2a   : > { %v1834_v20 = vpop.f32.mrf.mxu1 }
 0xb2b   : > { %v1835_v43 = vadd.f32 %v2317_v18, %v1834_v20 }
 0xb2c   : > { %v2444_v21 = vpop.f32.mrf.mxu1 }
 0xb2d   : > { %v1841_v25 = vmax.f32 %v1835_v43, 0.0 }
 0xb2e   : > { %v1837_v22 = vpop.f32.mrf.mxu1 }
 0xb2f   : > { %v1838_v23 = vadd.f32 %v2317_v18, %v1837_v22 }
 0xb30   : > { %v2445_v24 = vpop.f32.mrf.mxu1 }
 0xb31   : > { %v1842_v26 = vmax.f32 %v1838_v23, 0.0 }
 0xb33   : > { %v1847_v27 = vpack.c.bf16 %v1842_v26, %v1841_v25 }
 0xb35   : > { %2451 = vmatmul.mubr.msk.bf16.vlgmr.msra.gmra.mxu0 %vm1010_vm1, %v1847_v27 }
 0xbf5   : > { %v1904_v29 = vpop.f32.mrf.mxu0 }
 0xbf6   : > { %v1905_v30 = vadd.f32 %v2321_v28, %v1904_v29 }
 0xbf7   : > { %v2452_v31 = vpop.f32.mrf.mxu0 }
 0xbf8   : > { %v1911_v33 = vadd.f32 %v1905_v30, %v1771_v48 }
 0xbf9   : > { %v1907_v34 = vpop.f32.mrf.mxu0 }
 0xbfa   : > { %v1925_v35 = vmul.f32 %v1918_v32, %v1911_v33  ;;  %v1908_v38 = vadd.f32 %v2321_v28, %v1907_v34 }
 0xbfb   : > { %v2453_v39 = vpop.f32.mrf.mxu0 }
 0xbfc   : > { %1927 = vst.msk [vmem:[#allocation2] sm:$0xff] %vm1010_vm1, %v1925_v35  ;;  %v1912_v41 = vadd.f32 %v1908_v38, %v1772_v12  ;;  %1932 = sbr.rel (%p2325_p9) target bundleno = 3535 (0xdcf), region = 148 }
 0xbfe   : > { %v1926_v42 = vmul.f32 %v1923_v40, %v1912_v41 }
 0xc00   : > { %1928 = vst.msk [vmem:[#allocation2 + $0x8] sm:$0xff] %vm1010_vm1, %v1926_v42 }
 0xc01   : > { %v2326_v2 = vld [vmem:[%s3788_s0] ss:$0 sm:$0xff]  ;;  %v1979_v7 = vld [vmem:[#allocation6] sm:$0xff]  ;;  %v1980_v11 = vld [vmem:[#allocation6 + $0x8] sm:$0xff]  ;;  %vm1999_vm8 = vcmask 7168   ;;  %vm2002_vm9 = vcmask 15360  }
 0xc02   : > { %v2327_v4 = vld [vmem:[%s3789_s27] ss:$0 sm:$0xff]  ;;  %v1990_v14 = vld [vmem:[#allocation8 + $0x8] sm:$0xff] }
 0xc03   : > { %v1933_v44 = vld [vmem:[#allocation2] sm:$0xff] }
 0xc04   : > { %v1937_v46 = vsel %vm1010_vm1, %v1933_v44, 0.0  ;;  %v1989_v62 = vld [vmem:[#allocation8] sm:$0xff] }
 0xc05   : > { %1938 = vadd.xlane.f32.xlu0 %v1937_v46 }
 0xc07   : > { %v1934_v45 = vld [vmem:[#allocation2 + $0x8] sm:$0xff] }
 0xc08   : > { %v1940_v47 = vsel %vm1010_vm1, %v1934_v45, 0.0 }
 0xc09   : > { %1941 = vadd.xlane.f32.xlu0 %v1940_v47 }
 0xc8e   : > { %v1939_v49 = vpop.xlane.xlu0 %1938 }
 0xc8f   : > { %v1943_v50 = vmul.f32 0.03125, %v1939_v49 }
 0xc91   : > { %v1945_v51 = vsub.f32 %v1933_v44, %v1943_v50 }
 0xc92   : > { %v1942_v52 = vpop.xlane.xlu0 %1941 }
 0xc93   : > { %v1944_v53 = vmul.f32 0.03125, %v1942_v52  ;;  %v1947_v54 = vmul.f32 %v1945_v51, %v1945_v51 }
 0xc95   : > { %v1946_v55 = vsub.f32 %v1934_v45, %v1944_v53  ;;  %v1949_v56 = vsel %vm1010_vm1, %v1947_v54, 0.0 }
 0xc96   : > { %1950 = vadd.xlane.f32.xlu1 %v1949_v56 }
 0xc97   : > { %v1948_v57 = vmul.f32 %v1946_v55, %v1946_v55 }
 0xc99   : > { %v1952_v36 = vsel %vm1010_vm1, %v1948_v57, 0.0 }
 0xc9a   : > { %1953 = vadd.xlane.f32.xlu1 %v1952_v36 }
 0xd1f   : > { %v1951_v58 = vpop.xlane.xlu1 %1950 }
 0xd20   : > { %v1955_v59 = vmul.f32 0.03125, %v1951_v58 }
 0xd22   : > { %v1957_v60 = vadd.f32 1e-08, %v1955_v59 }
 0xd23   : > { %v1954_v37 = vpop.xlane.xlu1 %1953 }
 0xd24   : > { %2601 = vrsqrt.f32 %v1957_v60  ;;  %v1956_v61 = vmul.f32 0.03125, %v1954_v37 }
 0xd26   : > { %v1958_v0 = vadd.f32 1e-08, %v1956_v61 }
 0xd28   : > { %2603 = vrsqrt.f32 %v1958_v0 }
 0xd31   : > { %v2602_v1 = vpop.eup %2601 }
 0xd32   : > { %v1961_v3 = vmul.f32 %v2602_v1, %v1945_v51 }
 0xd34   : > { %v1969_v5 = vmul.f32 %v2326_v2, %v1961_v3 }
 0xd35   : > { %v2604_v6 = vpop.eup %2603 }
 0xd36   : > { %v1977_v8 = vadd.f32 %v2327_v4, %v1969_v5  ;;  %v1962_v9 = vmul.f32 %v2604_v6, %v1946_v55 }
 0xd38   : > { %v1981_v63 = vmul.f32 %v1979_v7, %v1977_v8  ;;  %v1970_v10 = vmul.f32 %v2326_v2, %v1962_v9  ;;  %v1991_v12 = vmul.f32 %v1989_v62, %v1977_v8 }
 0xd3a   : > { %v1983_v48 = vsel %vm1010_vm1, %v1981_v63, 0.0  ;;  %v1978_v13 = vadd.f32 %v2327_v4, %v1970_v10  ;;  %v1993_v16 = vsel %vm1010_vm1, %v1991_v12, 0.0 }
 0xd3b   : > { %1984 = vadd.xlane.f32.xlu0 %v1983_v48 }
 0xd3c   : > { %v1982_v15 = vmul.f32 %v1980_v11, %v1978_v13  ;;  %v1992_v19 = vmul.f32 %v1990_v14, %v1978_v13 }
 0xd3e   : > { %v1986_v17 = vsel %vm1010_vm1, %v1982_v15, 0.0  ;;  %v1996_v18 = vsel %vm1010_vm1, %v1992_v19, 0.0 }
 0xd3f   : > { %1994 = vadd.xlane.f32.xlu0 %v1993_v16  ;;  %1987 = vadd.xlane.f32.xlu1 %v1986_v17 }
 0xd43   : > { %1997 = vadd.xlane.f32.xlu1 %v1996_v18 }
 0xdc4   : > { %v1985_v20 = vpop.xlane.xlu0 %1984 }
 0xdc8   : > { %v1988_v21 = vpop.xlane.xlu1 %1987  ;;  %v1995_v43 = vpop.xlane.xlu0 %1994 }
 0xdc9   : > { %v2000_v22 = vsel %vm1999_vm8, %v1985_v20, %v1995_v43 }
 0xdca   : > { %2003 = vst.msk [vmem:[%s3790_s4] sm:$0xff] %vm2002_vm9, %v2000_v22 }
 0xdcc   : > { %v1998_v23 = vpop.xlane.xlu1 %1997 }
 0xdcd   : > { %v2001_v24 = vsel %vm1999_vm8, %v1988_v21, %v1998_v23 }
 0xdce   : > { %2004 = vst.msk [vmem:[%s3790_s4 + $0x8] sm:$0xff] %vm2002_vm9, %v2001_v24 }
 0xdcf PF: > { %s3791_s24 = sld [smem:[#allocation27_spill]]  ;;  %s3794_s1 = smov %s2925_s22 }
 0xdd0   : > { %s3792_s11 = sld [smem:[#allocation26_spill]] }
 0xdd1   : > { %s3793_s23 = sld [smem:[#allocation28_spill]] }
 0xdd5   : > { %p41_p1 = scmp.ge.s32.totalorder %s3791_s24, 4  }
 0xdd6   : > { %s3795_s22 = smov %s3792_s11 }
 0xdd7   :  { %43 = sbr.rel (!%p41_p1) target bundleno = 28 (0x1c), region = 250 }
 0xddc   :  { %2016 = vsyncpa [#allocation5], 1 }
 0xddd   :  { %2018 = vsyncpa [#allocation5 + $0x1], 1 }
 0xdde   :  { %2019 = vsyncpa [#allocation7], 1 }
 0xddf   :  { %2020 = vsyncpa [#allocation10], 1 }
 0xde0   :  { %2022 = vsyncpa [#allocation10 + $0x1], 1 }
 0xde1   :  { %2023 = vsyncpa [#allocation13], 1 }
 0xde2   :  { %2025 = vsyncpa [#allocation13 + $0x1], 1 }
 0xde3   :  { %2026 = vsyncpa [#allocation16], 1 }
 0xde4   :  { %2028 = vsyncpa [#allocation16 + $0x1], 1 }
 0xde5   :  { %2029 = vsyncpa [#allocation19], 1 }
 0xde6   :  { %2031 = vsyncpa [#allocation19 + $0x1], 1 }

</bundles_post_ra>
